<compile_context>
chip_gen: v7x
topology: tpu7x:2x2x1
jax: 0.10.0
libtpu: 0.0.40
codegen_flags: <defaults>
</compile_context>

<pallas_src>
import math
import jax
import jax.numpy as jnp
from jax.experimental import pallas as pl
from jax.experimental.pallas import tpu as pltpu


def _round_up(x, m):
    return (x + m - 1) // m * m


# ---------------------------------------------------------------------------
# Fused kernel factory: L stacked ReLU-RNN layers + final Linear, one call.
# Ref order: x, [w_ih, w_hh, bias] * L, w_fc, b_fc, out, seq_scratch
#   x        : (T*B_pad, D)        time-major, rows ordered t-major/batch-minor
#   w_ih[l]  : (D_in_l, M_pad)     pre-transposed (x @ W layout)
#   w_hh[l]  : (M_pad, M_pad)      pre-transposed
#   bias[l]  : (1, M_pad)          b_ih + b_hh folded
#   w_fc     : (M_pad, K_pad)      pre-transposed
#   b_fc     : (1, K_pad)
#   out      : (B_pad, K_pad)
#   seq      : (T*B_pad, M_pad)    VMEM scratch holding a layer's output seq
# ---------------------------------------------------------------------------
def make_fused_rnn_kernel(L, T, B_pad, D_in):
    def kernel(*refs):
        x_ref = refs[0]
        wfc_ref = refs[3 * L + 1]
        bfc_ref = refs[3 * L + 2]
        out_ref = refs[3 * L + 3]
        seq_ref = refs[3 * L + 4]

        M_pad = wfc_ref.shape[0]

        cur = x_ref[...]                        # layer input seq (T*B_pad, D_l)
        h = None
        for l in range(L):
            w_ih = refs[1 + 3 * l][...]
            w_hh = refs[2 + 3 * l][...]
            b = refs[3 + 3 * l][...]

            # Hoisted input projection + bias (only the W_hh term is serial).
            if l == 0 and D_in == 1:
                # D=1: VPU broadcast multiply-add, skip a degenerate MXU pass.
                xw = cur * w_ih + b             # (T*B_pad,1)*(1,M_pad)+(1,M_pad)
            else:
                xw = jnp.dot(cur, w_ih,
                             preferred_element_type=jnp.float32) + b

            # Sequential recurrence; h0 = 0 for every layer (as in torch).
            h = jnp.zeros((B_pad, M_pad), dtype=jnp.float32)
            for t in range(T):                  # static T -> fully unrolled
                pre = xw[t * B_pad:(t + 1) * B_pad, :] + jnp.dot(
                    h, w_hh, preferred_element_type=jnp.float32)
                h = jnp.maximum(pre, 0.0)
                if l < L - 1:
                    seq_ref[t * B_pad:(t + 1) * B_pad, :] = h
            if l < L - 1:
                cur = seq_ref[...]              # next layer's input sequence

        # Final Linear on the top layer's last-timestep hidden state
        # (== out[:, -1, :] in the PyTorch module).
        out_ref[...] = (jnp.dot(h, wfc_ref[...],
                                preferred_element_type=jnp.float32)
                        + bfc_ref[...])
    return kernel


# ---------------------------------------------------------------------------
# Module wrapper with deterministic PyTorch-style init (weights stored
# pre-transposed and zero-padded to TPU tiles).
# ---------------------------------------------------------------------------
class SimpleRNNPallas:
    def __init__(self, n_inputs, n_hidden, n_rnnlayers, n_outputs, key):
        self.D, self.M, self.L, self.K = n_inputs, n_hidden, n_rnnlayers, n_outputs
        self.M_pad = _round_up(n_hidden, 128)
        self.K_pad = _round_up(n_outputs, 128)
        scale = 1.0 / math.sqrt(n_hidden)

        def unif(k, shape):
            return jax.random.uniform(k, shape, jnp.float32, -scale, scale)

        keys = jax.random.split(key, 4 * n_rnnlayers + 2)
        self.w_ih, self.w_hh, self.bias = [], [], []
        for layer in range(n_rnnlayers):
            d_in = n_inputs if layer == 0 else n_hidden
            k0, k1, k2, k3 = keys[4 * layer: 4 * layer + 4]
            w_ih_t = unif(k0, (n_hidden, d_in)).T          # (d_in, M), pre-T
            w_hh_t = unif(k1, (n_hidden, n_hidden)).T      # (M, M),   pre-T
            b = (unif(k2, (n_hidden,)) + unif(k3, (n_hidden,))
                 ).reshape(1, n_hidden)                    # b_ih + b_hh folded
            d_in_pad = d_in if layer == 0 else self.M_pad
            self.w_ih.append(jnp.zeros((d_in_pad, self.M_pad), jnp.float32)
                             .at[:d_in, :n_hidden].set(w_ih_t))
            self.w_hh.append(jnp.zeros((self.M_pad, self.M_pad), jnp.float32)
                             .at[:n_hidden, :n_hidden].set(w_hh_t))
            self.bias.append(jnp.zeros((1, self.M_pad), jnp.float32)
                             .at[:, :n_hidden].set(b))
        kf_w, kf_b = keys[-2], keys[-1]
        w_fc = jax.random.uniform(kf_w, (n_outputs, n_hidden), jnp.float32,
                                  -scale, scale).T          # (M, K), pre-T
        b_fc = jax.random.uniform(kf_b, (n_outputs,), jnp.float32,
                                  -scale, scale)
        self.w_fc = (jnp.zeros((self.M_pad, self.K_pad), jnp.float32)
                     .at[:n_hidden, :n_outputs].set(w_fc))
        self.b_fc = (jnp.zeros((1, self.K_pad), jnp.float32)
                     .at[:, :n_outputs].set(b_fc))

    def __call__(self, X):                       # X: (B, T, D), batch_first
        B, T, D = X.shape
        B_pad = _round_up(B, 8)
        x = jnp.transpose(X, (1, 0, 2))          # -> (T, B, D) time-major
        x = jnp.pad(x, ((0, 0), (0, B_pad - B), (0, 0)))
        x = x.reshape(T * B_pad, D).astype(jnp.float32)

        args = [x]
        for layer in range(self.L):
            args += [self.w_ih[layer], self.w_hh[layer], self.bias[layer]]
        args += [self.w_fc, self.b_fc]

        out = pl.pallas_call(
            make_fused_rnn_kernel(self.L, T, B_pad, D),
            out_shape=jax.ShapeDtypeStruct((B_pad, self.K_pad), jnp.float32),
            scratch_shapes=[pltpu.VMEM((T * B_pad, self.M_pad), jnp.float32)],
        )(*args)
        return out[:B, :self.K]


# Pure-JAX reference (uses the same weights, un-padded) for a correctness gate.
def reference_forward(model, X):
    B, T, D = X.shape
    M, K, L = model.M, model.K, model.L
    seq = X.astype(jnp.float32)                  # (B, T, d_in)
    for l in range(L):
        d_in = D if l == 0 else M
        w_ih = model.w_ih[l][:d_in, :M]
        w_hh = model.w_hh[l][:M, :M]
        b = model.bias[l][:, :M]
        h = jnp.zeros((B, M), jnp.float32)
        outs = []
        for t in range(T):
            h = jnp.maximum(seq[:, t, :] @ w_ih + h @ w_hh + b, 0.0)
            outs.append(h)
        seq = jnp.stack(outs, axis=1)            # (B, T, M)
    return seq[:, -1, :] @ model.w_fc[:M, :K] + model.b_fc[:, :K]


if __name__ == "__main__":
    # T = 10 as in the reference script; X reshaped to (-1, T, 1)
    B, T, D, M, L, K = 2, 10, 1, 32, 2, 1
    key = jax.random.PRNGKey(0)
    k_x, k_p = jax.random.split(key)
    X = jax.random.normal(k_x, (B, T, D), jnp.float32)

    model = SimpleRNNPallas(n_inputs=D, n_hidden=M, n_rnnlayers=L,
                            n_outputs=K, key=k_p)
    out = model(X)
    jax.block_until_ready(out)
    assert out.shape == (B, K)

    ref = reference_forward(model, X)
    assert jnp.allclose(out, ref, atol=1e-4, rtol=1e-4)
    print("KERNEL_OK")
</pallas_src>

<mosaic_0001>
module attributes {stable_mosaic.version = 11 : i64} {
  func.func @kernel(%arg0: memref<80x1xf32, #tpu.memory_space<vmem>>, %arg1: memref<1x128xf32, #tpu.memory_space<vmem>>, %arg2: memref<128x128xf32, #tpu.memory_space<vmem>>, %arg3: memref<1x128xf32, #tpu.memory_space<vmem>>, %arg4: memref<128x128xf32, #tpu.memory_space<vmem>>, %arg5: memref<128x128xf32, #tpu.memory_space<vmem>>, %arg6: memref<1x128xf32, #tpu.memory_space<vmem>>, %arg7: memref<128x128xf32, #tpu.memory_space<vmem>>, %arg8: memref<1x128xf32, #tpu.memory_space<vmem>>, %arg9: memref<8x128xf32, #tpu.memory_space<vmem>>, %arg10: memref<80x128xf32, #tpu.memory_space<vmem>>) attributes {dimension_semantics = [], scalar_prefetch = 0 : i64, scratch_operands = 1 : i64, tpu.core_type = #tpu.core_type<tc>} {
    %c0 = arith.constant 0 : index
    %c0_0 = arith.constant 0 : index
    %0 = vector.load %arg0[%c0, %c0_0] : memref<80x1xf32, #tpu.memory_space<vmem>>, vector<80x1xf32>
    %c0_1 = arith.constant 0 : index
    %c0_2 = arith.constant 0 : index
    %1 = vector.load %arg1[%c0_1, %c0_2] : memref<1x128xf32, #tpu.memory_space<vmem>>, vector<1x128xf32>
    %c0_3 = arith.constant 0 : index
    %c0_4 = arith.constant 0 : index
    %2 = vector.load %arg2[%c0_3, %c0_4] : memref<128x128xf32, #tpu.memory_space<vmem>>, vector<128x128xf32>
    %c0_5 = arith.constant 0 : index
    %c0_6 = arith.constant 0 : index
    %3 = vector.load %arg3[%c0_5, %c0_6] : memref<1x128xf32, #tpu.memory_space<vmem>>, vector<1x128xf32>
    %4 = vector.broadcast %0 : vector<80x1xf32> to vector<80x128xf32>
    %5 = vector.broadcast %1 : vector<1x128xf32> to vector<80x128xf32>
    %6 = arith.mulf %4, %5 : vector<80x128xf32>
    %7 = vector.broadcast %3 : vector<1x128xf32> to vector<80x128xf32>
    %8 = arith.addf %6, %7 : vector<80x128xf32>
    %cst = arith.constant 0.000000e+00 : f32
    %9 = vector.broadcast %cst : f32 to vector<8x128xf32>
    %10 = vector.extract_strided_slice %8 {offsets = [0, 0], sizes = [8, 128], strides = [1, 1]} : vector<80x128xf32> to vector<8x128xf32>
    %cst_7 = arith.constant dense<0.000000e+00> : vector<8x128xf32>
    %11 = tpu.matmul %9, %2, %cst_7 {dimension_numbers = #tpu.dot_dimension_numbers<[1], [0], [0], [1], [0, 0, 1, 1], [], []>} : vector<8x128xf32>, vector<128x128xf32>, vector<8x128xf32> -> vector<8x128xf32>
    %12 = arith.addf %10, %11 : vector<8x128xf32>
    %cst_8 = arith.constant 0.000000e+00 : f32
    %13 = vector.broadcast %cst_8 : f32 to vector<8x128xf32>
    %14 = arith.maximumf %12, %13 : vector<8x128xf32>
    %c0_9 = arith.constant 0 : index
    %c0_10 = arith.constant 0 : index
    %15 = vector.load %arg10[%c0_9, %c0_10] : memref<80x128xf32, #tpu.memory_space<vmem>>, vector<8x128xf32>
    tpu.vector_store %arg10[%c0_9, %c0_10], %14 {strides = array<i32>} : memref<80x128xf32, #tpu.memory_space<vmem>>, vector<8x128xf32>,
    %16 = vector.extract_strided_slice %8 {offsets = [8, 0], sizes = [8, 128], strides = [1, 1]} : vector<80x128xf32> to vector<8x128xf32>
    %cst_11 = arith.constant dense<0.000000e+00> : vector<8x128xf32>
    %17 = tpu.matmul %14, %2, %cst_11 {dimension_numbers = #tpu.dot_dimension_numbers<[1], [0], [0], [1], [0, 0, 1, 1], [], []>} : vector<8x128xf32>, vector<128x128xf32>, vector<8x128xf32> -> vector<8x128xf32>
    %18 = arith.addf %16, %17 : vector<8x128xf32>
    %cst_12 = arith.constant 0.000000e+00 : f32
    %19 = vector.broadcast %cst_12 : f32 to vector<8x128xf32>
    %20 = arith.maximumf %18, %19 : vector<8x128xf32>
    %c8 = arith.constant 8 : index
    %c0_13 = arith.constant 0 : index
    %21 = vector.load %arg10[%c8, %c0_13] : memref<80x128xf32, #tpu.memory_space<vmem>>, vector<8x128xf32>
    tpu.vector_store %arg10[%c8, %c0_13], %20 {strides = array<i32>} : memref<80x128xf32, #tpu.memory_space<vmem>>, vector<8x128xf32>,
    %22 = vector.extract_strided_slice %8 {offsets = [16, 0], sizes = [8, 128], strides = [1, 1]} : vector<80x128xf32> to vector<8x128xf32>
    %cst_14 = arith.constant dense<0.000000e+00> : vector<8x128xf32>
    %23 = tpu.matmul %20, %2, %cst_14 {dimension_numbers = #tpu.dot_dimension_numbers<[1], [0], [0], [1], [0, 0, 1, 1], [], []>} : vector<8x128xf32>, vector<128x128xf32>, vector<8x128xf32> -> vector<8x128xf32>
    %24 = arith.addf %22, %23 : vector<8x128xf32>
    %cst_15 = arith.constant 0.000000e+00 : f32
    %25 = vector.broadcast %cst_15 : f32 to vector<8x128xf32>
    %26 = arith.maximumf %24, %25 : vector<8x128xf32>
    %c16 = arith.constant 16 : index
    %c0_16 = arith.constant 0 : index
    %27 = vector.load %arg10[%c16, %c0_16] : memref<80x128xf32, #tpu.memory_space<vmem>>, vector<8x128xf32>
    tpu.vector_store %arg10[%c16, %c0_16], %26 {strides = array<i32>} : memref<80x128xf32, #tpu.memory_space<vmem>>, vector<8x128xf32>,
    %28 = vector.extract_strided_slice %8 {offsets = [24, 0], sizes = [8, 128], strides = [1, 1]} : vector<80x128xf32> to vector<8x128xf32>
    %cst_17 = arith.constant dense<0.000000e+00> : vector<8x128xf32>
    %29 = tpu.matmul %26, %2, %cst_17 {dimension_numbers = #tpu.dot_dimension_numbers<[1], [0], [0], [1], [0, 0, 1, 1], [], []>} : vector<8x128xf32>, vector<128x128xf32>, vector<8x128xf32> -> vector<8x128xf32>
    %30 = arith.addf %28, %29 : vector<8x128xf32>
    %cst_18 = arith.constant 0.000000e+00 : f32
    %31 = vector.broadcast %cst_18 : f32 to vector<8x128xf32>
    %32 = arith.maximumf %30, %31 : vector<8x128xf32>
    %c24 = arith.constant 24 : index
    %c0_19 = arith.constant 0 : index
    %33 = vector.load %arg10[%c24, %c0_19] : memref<80x128xf32, #tpu.memory_space<vmem>>, vector<8x128xf32>
    tpu.vector_store %arg10[%c24, %c0_19], %32 {strides = array<i32>} : memref<80x128xf32, #tpu.memory_space<vmem>>, vector<8x128xf32>,
    %34 = vector.extract_strided_slice %8 {offsets = [32, 0], sizes = [8, 128], strides = [1, 1]} : vector<80x128xf32> to vector<8x128xf32>
    %cst_20 = arith.constant dense<0.000000e+00> : vector<8x128xf32>
    %35 = tpu.matmul %32, %2, %cst_20 {dimension_numbers = #tpu.dot_dimension_numbers<[1], [0], [0], [1], [0, 0, 1, 1], [], []>} : vector<8x128xf32>, vector<128x128xf32>, vector<8x128xf32> -> vector<8x128xf32>
    %36 = arith.addf %34, %35 : vector<8x128xf32>
    %cst_21 = arith.constant 0.000000e+00 : f32
    %37 = vector.broadcast %cst_21 : f32 to vector<8x128xf32>
    %38 = arith.maximumf %36, %37 : vector<8x128xf32>
    %c32 = arith.constant 32 : index
    %c0_22 = arith.constant 0 : index
    %39 = vector.load %arg10[%c32, %c0_22] : memref<80x128xf32, #tpu.memory_space<vmem>>, vector<8x128xf32>
    tpu.vector_store %arg10[%c32, %c0_22], %38 {strides = array<i32>} : memref<80x128xf32, #tpu.memory_space<vmem>>, vector<8x128xf32>,
    %40 = vector.extract_strided_slice %8 {offsets = [40, 0], sizes = [8, 128], strides = [1, 1]} : vector<80x128xf32> to vector<8x128xf32>
    %cst_23 = arith.constant dense<0.000000e+00> : vector<8x128xf32>
    %41 = tpu.matmul %38, %2, %cst_23 {dimension_numbers = #tpu.dot_dimension_numbers<[1], [0], [0], [1], [0, 0, 1, 1], [], []>} : vector<8x128xf32>, vector<128x128xf32>, vector<8x128xf32> -> vector<8x128xf32>
    %42 = arith.addf %40, %41 : vector<8x128xf32>
    %cst_24 = arith.constant 0.000000e+00 : f32
    %43 = vector.broadcast %cst_24 : f32 to vector<8x128xf32>
    %44 = arith.maximumf %42, %43 : vector<8x128xf32>
    %c40 = arith.constant 40 : index
    %c0_25 = arith.constant 0 : index
    %45 = vector.load %arg10[%c40, %c0_25] : memref<80x128xf32, #tpu.memory_space<vmem>>, vector<8x128xf32>
    tpu.vector_store %arg10[%c40, %c0_25], %44 {strides = array<i32>} : memref<80x128xf32, #tpu.memory_space<vmem>>, vector<8x128xf32>,
    %46 = vector.extract_strided_slice %8 {offsets = [48, 0], sizes = [8, 128], strides = [1, 1]} : vector<80x128xf32> to vector<8x128xf32>
    %cst_26 = arith.constant dense<0.000000e+00> : vector<8x128xf32>
    %47 = tpu.matmul %44, %2, %cst_26 {dimension_numbers = #tpu.dot_dimension_numbers<[1], [0], [0], [1], [0, 0, 1, 1], [], []>} : vector<8x128xf32>, vector<128x128xf32>, vector<8x128xf32> -> vector<8x128xf32>
    %48 = arith.addf %46, %47 : vector<8x128xf32>
    %cst_27 = arith.constant 0.000000e+00 : f32
    %49 = vector.broadcast %cst_27 : f32 to vector<8x128xf32>
    %50 = arith.maximumf %48, %49 : vector<8x128xf32>
    %c48 = arith.constant 48 : index
    %c0_28 = arith.constant 0 : index
    %51 = vector.load %arg10[%c48, %c0_28] : memref<80x128xf32, #tpu.memory_space<vmem>>, vector<8x128xf32>
    tpu.vector_store %arg10[%c48, %c0_28], %50 {strides = array<i32>} : memref<80x128xf32, #tpu.memory_space<vmem>>, vector<8x128xf32>,
    %52 = vector.extract_strided_slice %8 {offsets = [56, 0], sizes = [8, 128], strides = [1, 1]} : vector<80x128xf32> to vector<8x128xf32>
    %cst_29 = arith.constant dense<0.000000e+00> : vector<8x128xf32>
    %53 = tpu.matmul %50, %2, %cst_29 {dimension_numbers = #tpu.dot_dimension_numbers<[1], [0], [0], [1], [0, 0, 1, 1], [], []>} : vector<8x128xf32>, vector<128x128xf32>, vector<8x128xf32> -> vector<8x128xf32>
    %54 = arith.addf %52, %53 : vector<8x128xf32>
    %cst_30 = arith.constant 0.000000e+00 : f32
    %55 = vector.broadcast %cst_30 : f32 to vector<8x128xf32>
    %56 = arith.maximumf %54, %55 : vector<8x128xf32>
    %c56 = arith.constant 56 : index
    %c0_31 = arith.constant 0 : index
    %57 = vector.load %arg10[%c56, %c0_31] : memref<80x128xf32, #tpu.memory_space<vmem>>, vector<8x128xf32>
    tpu.vector_store %arg10[%c56, %c0_31], %56 {strides = array<i32>} : memref<80x128xf32, #tpu.memory_space<vmem>>, vector<8x128xf32>,
    %58 = vector.extract_strided_slice %8 {offsets = [64, 0], sizes = [8, 128], strides = [1, 1]} : vector<80x128xf32> to vector<8x128xf32>
    %cst_32 = arith.constant dense<0.000000e+00> : vector<8x128xf32>
    %59 = tpu.matmul %56, %2, %cst_32 {dimension_numbers = #tpu.dot_dimension_numbers<[1], [0], [0], [1], [0, 0, 1, 1], [], []>} : vector<8x128xf32>, vector<128x128xf32>, vector<8x128xf32> -> vector<8x128xf32>
    %60 = arith.addf %58, %59 : vector<8x128xf32>
    %cst_33 = arith.constant 0.000000e+00 : f32
    %61 = vector.broadcast %cst_33 : f32 to vector<8x128xf32>
    %62 = arith.maximumf %60, %61 : vector<8x128xf32>
    %c64 = arith.constant 64 : index
    %c0_34 = arith.constant 0 : index
    %63 = vector.load %arg10[%c64, %c0_34] : memref<80x128xf32, #tpu.memory_space<vmem>>, vector<8x128xf32>
    tpu.vector_store %arg10[%c64, %c0_34], %62 {strides = array<i32>} : memref<80x128xf32, #tpu.memory_space<vmem>>, vector<8x128xf32>,
    %64 = vector.extract_strided_slice %8 {offsets = [72, 0], sizes = [8, 128], strides = [1, 1]} : vector<80x128xf32> to vector<8x128xf32>
    %cst_35 = arith.constant dense<0.000000e+00> : vector<8x128xf32>
    %65 = tpu.matmul %62, %2, %cst_35 {dimension_numbers = #tpu.dot_dimension_numbers<[1], [0], [0], [1], [0, 0, 1, 1], [], []>} : vector<8x128xf32>, vector<128x128xf32>, vector<8x128xf32> -> vector<8x128xf32>
    %66 = arith.addf %64, %65 : vector<8x128xf32>
    %cst_36 = arith.constant 0.000000e+00 : f32
    %67 = vector.broadcast %cst_36 : f32 to vector<8x128xf32>
    %68 = arith.maximumf %66, %67 : vector<8x128xf32>
    %c72 = arith.constant 72 : index
    %c0_37 = arith.constant 0 : index
    %69 = vector.load %arg10[%c72, %c0_37] : memref<80x128xf32, #tpu.memory_space<vmem>>, vector<8x128xf32>
    tpu.vector_store %arg10[%c72, %c0_37], %68 {strides = array<i32>} : memref<80x128xf32, #tpu.memory_space<vmem>>, vector<8x128xf32>,
    %c0_38 = arith.constant 0 : index
    %c0_39 = arith.constant 0 : index
    %70 = vector.load %arg10[%c0_38, %c0_39] : memref<80x128xf32, #tpu.memory_space<vmem>>, vector<80x128xf32>
    %c0_40 = arith.constant 0 : index
    %c0_41 = arith.constant 0 : index
    %71 = vector.load %arg4[%c0_40, %c0_41] : memref<128x128xf32, #tpu.memory_space<vmem>>, vector<128x128xf32>
    %c0_42 = arith.constant 0 : index
    %c0_43 = arith.constant 0 : index
    %72 = vector.load %arg5[%c0_42, %c0_43] : memref<128x128xf32, #tpu.memory_space<vmem>>, vector<128x128xf32>
    %c0_44 = arith.constant 0 : index
    %c0_45 = arith.constant 0 : index
    %73 = vector.load %arg6[%c0_44, %c0_45] : memref<1x128xf32, #tpu.memory_space<vmem>>, vector<1x128xf32>
    %cst_46 = arith.constant dense<0.000000e+00> : vector<80x128xf32>
    %74 = tpu.matmul %70, %71, %cst_46 {dimension_numbers = #tpu.dot_dimension_numbers<[1], [0], [0], [1], [0, 0, 1, 1], [], []>} : vector<80x128xf32>, vector<128x128xf32>, vector<80x128xf32> -> vector<80x128xf32>
    %75 = vector.broadcast %73 : vector<1x128xf32> to vector<80x128xf32>
    %76 = arith.addf %74, %75 : vector<80x128xf32>
    %cst_47 = arith.constant 0.000000e+00 : f32
    %77 = vector.broadcast %cst_47 : f32 to vector<8x128xf32>
    %78 = vector.extract_strided_slice %76 {offsets = [0, 0], sizes = [8, 128], strides = [1, 1]} : vector<80x128xf32> to vector<8x128xf32>
    %cst_48 = arith.constant dense<0.000000e+00> : vector<8x128xf32>
    %79 = tpu.matmul %77, %72, %cst_48 {dimension_numbers = #tpu.dot_dimension_numbers<[1], [0], [0], [1], [0, 0, 1, 1], [], []>} : vector<8x128xf32>, vector<128x128xf32>, vector<8x128xf32> -> vector<8x128xf32>
    %80 = arith.addf %78, %79 : vector<8x128xf32>
    %cst_49 = arith.constant 0.000000e+00 : f32
    %81 = vector.broadcast %cst_49 : f32 to vector<8x128xf32>
    %82 = arith.maximumf %80, %81 : vector<8x128xf32>
    %83 = vector.extract_strided_slice %76 {offsets = [8, 0], sizes = [8, 128], strides = [1, 1]} : vector<80x128xf32> to vector<8x128xf32>
    %cst_50 = arith.constant dense<0.000000e+00> : vector<8x128xf32>
    %84 = tpu.matmul %82, %72, %cst_50 {dimension_numbers = #tpu.dot_dimension_numbers<[1], [0], [0], [1], [0, 0, 1, 1], [], []>} : vector<8x128xf32>, vector<128x128xf32>, vector<8x128xf32> -> vector<8x128xf32>
    %85 = arith.addf %83, %84 : vector<8x128xf32>
    %cst_51 = arith.constant 0.000000e+00 : f32
    %86 = vector.broadcast %cst_51 : f32 to vector<8x128xf32>
    %87 = arith.maximumf %85, %86 : vector<8x128xf32>
    %88 = vector.extract_strided_slice %76 {offsets = [16, 0], sizes = [8, 128], strides = [1, 1]} : vector<80x128xf32> to vector<8x128xf32>
    %cst_52 = arith.constant dense<0.000000e+00> : vector<8x128xf32>
    %89 = tpu.matmul %87, %72, %cst_52 {dimension_numbers = #tpu.dot_dimension_numbers<[1], [0], [0], [1], [0, 0, 1, 1], [], []>} : vector<8x128xf32>, vector<128x128xf32>, vector<8x128xf32> -> vector<8x128xf32>
    %90 = arith.addf %88, %89 : vector<8x128xf32>
    %cst_53 = arith.constant 0.000000e+00 : f32
    %91 = vector.broadcast %cst_53 : f32 to vector<8x128xf32>
    %92 = arith.maximumf %90, %91 : vector<8x128xf32>
    %93 = vector.extract_strided_slice %76 {offsets = [24, 0], sizes = [8, 128], strides = [1, 1]} : vector<80x128xf32> to vector<8x128xf32>
    %cst_54 = arith.constant dense<0.000000e+00> : vector<8x128xf32>
    %94 = tpu.matmul %92, %72, %cst_54 {dimension_numbers = #tpu.dot_dimension_numbers<[1], [0], [0], [1], [0, 0, 1, 1], [], []>} : vector<8x128xf32>, vector<128x128xf32>, vector<8x128xf32> -> vector<8x128xf32>
    %95 = arith.addf %93, %94 : vector<8x128xf32>
    %cst_55 = arith.constant 0.000000e+00 : f32
    %96 = vector.broadcast %cst_55 : f32 to vector<8x128xf32>
    %97 = arith.maximumf %95, %96 : vector<8x128xf32>
    %98 = vector.extract_strided_slice %76 {offsets = [32, 0], sizes = [8, 128], strides = [1, 1]} : vector<80x128xf32> to vector<8x128xf32>
    %cst_56 = arith.constant dense<0.000000e+00> : vector<8x128xf32>
    %99 = tpu.matmul %97, %72, %cst_56 {dimension_numbers = #tpu.dot_dimension_numbers<[1], [0], [0], [1], [0, 0, 1, 1], [], []>} : vector<8x128xf32>, vector<128x128xf32>, vector<8x128xf32> -> vector<8x128xf32>
    %100 = arith.addf %98, %99 : vector<8x128xf32>
    %cst_57 = arith.constant 0.000000e+00 : f32
    %101 = vector.broadcast %cst_57 : f32 to vector<8x128xf32>
    %102 = arith.maximumf %100, %101 : vector<8x128xf32>
    %103 = vector.extract_strided_slice %76 {offsets = [40, 0], sizes = [8, 128], strides = [1, 1]} : vector<80x128xf32> to vector<8x128xf32>
    %cst_58 = arith.constant dense<0.000000e+00> : vector<8x128xf32>
    %104 = tpu.matmul %102, %72, %cst_58 {dimension_numbers = #tpu.dot_dimension_numbers<[1], [0], [0], [1], [0, 0, 1, 1], [], []>} : vector<8x128xf32>, vector<128x128xf32>, vector<8x128xf32> -> vector<8x128xf32>
    %105 = arith.addf %103, %104 : vector<8x128xf32>
    %cst_59 = arith.constant 0.000000e+00 : f32
    %106 = vector.broadcast %cst_59 : f32 to vector<8x128xf32>
    %107 = arith.maximumf %105, %106 : vector<8x128xf32>
    %108 = vector.extract_strided_slice %76 {offsets = [48, 0], sizes = [8, 128], strides = [1, 1]} : vector<80x128xf32> to vector<8x128xf32>
    %cst_60 = arith.constant dense<0.000000e+00> : vector<8x128xf32>
    %109 = tpu.matmul %107, %72, %cst_60 {dimension_numbers = #tpu.dot_dimension_numbers<[1], [0], [0], [1], [0, 0, 1, 1], [], []>} : vector<8x128xf32>, vector<128x128xf32>, vector<8x128xf32> -> vector<8x128xf32>
    %110 = arith.addf %108, %109 : vector<8x128xf32>
    %cst_61 = arith.constant 0.000000e+00 : f32
    %111 = vector.broadcast %cst_61 : f32 to vector<8x128xf32>
    %112 = arith.maximumf %110, %111 : vector<8x128xf32>
    %113 = vector.extract_strided_slice %76 {offsets = [56, 0], sizes = [8, 128], strides = [1, 1]} : vector<80x128xf32> to vector<8x128xf32>
    %cst_62 = arith.constant dense<0.000000e+00> : vector<8x128xf32>
    %114 = tpu.matmul %112, %72, %cst_62 {dimension_numbers = #tpu.dot_dimension_numbers<[1], [0], [0], [1], [0, 0, 1, 1], [], []>} : vector<8x128xf32>, vector<128x128xf32>, vector<8x128xf32> -> vector<8x128xf32>
    %115 = arith.addf %113, %114 : vector<8x128xf32>
    %cst_63 = arith.constant 0.000000e+00 : f32
    %116 = vector.broadcast %cst_63 : f32 to vector<8x128xf32>
    %117 = arith.maximumf %115, %116 : vector<8x128xf32>
    %118 = vector.extract_strided_slice %76 {offsets = [64, 0], sizes = [8, 128], strides = [1, 1]} : vector<80x128xf32> to vector<8x128xf32>
    %cst_64 = arith.constant dense<0.000000e+00> : vector<8x128xf32>
    %119 = tpu.matmul %117, %72, %cst_64 {dimension_numbers = #tpu.dot_dimension_numbers<[1], [0], [0], [1], [0, 0, 1, 1], [], []>} : vector<8x128xf32>, vector<128x128xf32>, vector<8x128xf32> -> vector<8x128xf32>
    %120 = arith.addf %118, %119 : vector<8x128xf32>
    %cst_65 = arith.constant 0.000000e+00 : f32
    %121 = vector.broadcast %cst_65 : f32 to vector<8x128xf32>
    %122 = arith.maximumf %120, %121 : vector<8x128xf32>
    %123 = vector.extract_strided_slice %76 {offsets = [72, 0], sizes = [8, 128], strides = [1, 1]} : vector<80x128xf32> to vector<8x128xf32>
    %cst_66 = arith.constant dense<0.000000e+00> : vector<8x128xf32>
    %124 = tpu.matmul %122, %72, %cst_66 {dimension_numbers = #tpu.dot_dimension_numbers<[1], [0], [0], [1], [0, 0, 1, 1], [], []>} : vector<8x128xf32>, vector<128x128xf32>, vector<8x128xf32> -> vector<8x128xf32>
    %125 = arith.addf %123, %124 : vector<8x128xf32>
    %cst_67 = arith.constant 0.000000e+00 : f32
    %126 = vector.broadcast %cst_67 : f32 to vector<8x128xf32>
    %127 = arith.maximumf %125, %126 : vector<8x128xf32>
    %c0_68 = arith.constant 0 : index
    %c0_69 = arith.constant 0 : index
    %128 = vector.load %arg7[%c0_68, %c0_69] : memref<128x128xf32, #tpu.memory_space<vmem>>, vector<128x128xf32>
    %cst_70 = arith.constant dense<0.000000e+00> : vector<8x128xf32>
    %129 = tpu.matmul %127, %128, %cst_70 {dimension_numbers = #tpu.dot_dimension_numbers<[1], [0], [0], [1], [0, 0, 1, 1], [], []>} : vector<8x128xf32>, vector<128x128xf32>, vector<8x128xf32> -> vector<8x128xf32>
    %c0_71 = arith.constant 0 : index
    %c0_72 = arith.constant 0 : index
    %130 = vector.load %arg8[%c0_71, %c0_72] : memref<1x128xf32, #tpu.memory_space<vmem>>, vector<1x128xf32>
    %131 = vector.broadcast %130 : vector<1x128xf32> to vector<8x128xf32>
    %132 = arith.addf %129, %131 : vector<8x128xf32>
    %c0_73 = arith.constant 0 : index
    %c0_74 = arith.constant 0 : index
    %133 = vector.load %arg9[%c0_73, %c0_74] : memref<8x128xf32, #tpu.memory_space<vmem>>, vector<8x128xf32>
    tpu.vector_store %arg9[%c0_73, %c0_74], %132 {strides = array<i32>} : memref<8x128xf32, #tpu.memory_space<vmem>>, vector<8x128xf32>,
    return
  }
}

</mosaic_0001>

<bundles_post_ra>
// kernel: tpu_custom_call.1
= control target key start
LH: loop header
LB: loop body
LE: loop exit
PB: predicated region body
PF: predicated region fallthrough
CT: control target
= control target key end

     0   :  { %14 = vsyncpa [#allocation4], 0  ;;  %s4464_s0 = inlined_call_operand.vmem [shape: f32[80,1], index: 0, kind: input, shape index: {}]   ;;  %s4465_s1 = inlined_call_operand.vmem [shape: f32[1,128], index: 1, kind: input, shape index: {}]   ;;  %s4466_s2 = inlined_call_operand.hbm [shape: f32[128,128], index: 2, kind: input, shape index: {}]   ;;  %s4467_s3 = inlined_call_operand.vmem [shape: f32[1,128], index: 3, kind: input, shape index: {}]   ;;  %s4468_s4 = inlined_call_operand.hbm [shape: f32[128,128], index: 4, kind: input, shape index: {}]   ;;  %s4469_s5 = inlined_call_operand.hbm [shape: f32[128,128], index: 5, kind: input, shape index: {}]   ;;  %s4470_s6 = inlined_call_operand.vmem [shape: f32[1,128], index: 6, kind: input, shape index: {}]   ;;  %s4471_s7 = inlined_call_operand.hbm [shape: f32[128,128], index: 7, kind: input, shape index: {}]   ;;  %s4472_s8 = inlined_call_operand.vmem [shape: f32[1,128], index: 8, kind: input, shape index: {}]   ;;  %s4473_s9 = inlined_call_operand.hbm [shape: f32[8,128], index: 9, kind: output, shape index: {}]  }
   0x1   :  { %15 = vsyncpa [#allocation7], 0 }
   0x2   :  { %16 = vsyncpa [#allocation10], 0 }
   0x3   :  { %17 = vsyncpa [#allocation5], 0  ;;  %s3759_s30 = smov [#allocation6]   ;;  %s3760_s11 = smov [#allocation3]  }
   0x4   :  { %s41_s10 = sshll.u32 %s3759_s30, 4  ;;  %s27_s12 = sshll.u32 %s3760_s11, 4  ;;  %s42_s10 = int_to_ptr.vmem [resolvable:$true] %s41_s10  ;;  %s3820_s12 = int_to_ptr.vmem [resolvable:$true] %s27_s12 }
   0x5   :  { %s3641_s15 = scalar_lea.hbm %s4468_s4, 2048 }
   0x6   :  { %p3642_p0 = scmp.ne.s32.totalorder %s4468_s4, %s3641_s15  ;;  %p3645_p1 = scmp.lt.u32.totalorder %s3641_s15, %s4468_s4 }
   0x8   :  { %p3647_p2 = pnand %p3645_p1, %p3642_p0 }
   0xa   :  { %3650 = shalt.err (!%p3647_p2)
}
   0xb   :  { %s3651_s20 = scalar_lea.vmem %s42_s10, 2048  ;;  %p3656_p4 = scmp.lt.s32.totalorder %s42_s10, %s42_s10 }
   0xc   :  { %p3652_p3 = scmp.ne.s32.totalorder %s42_s10, %s3651_s20  ;;  %p3657_p5 = scmp.lt.s32.totalorder %s3651_s20, %s3651_s20 }
   0xe   :  { %p3658_p6 = por %p3657_p5, %p3656_p4 }
  0x10   :  { %p3659_p7 = pnand %p3658_p6, %p3652_p3 }
  0x12   :  { %3662 = shalt.err (!%p3659_p7)
}
  0x13   :  { %s3761_s21 = smov 128   ;;  %s3762_s22 = smov 8  }
  0x14   :  { %47 = dma.hbm_to_vmem [thread:$0]  %s4468_s4, 2048, %s42_s10, [#allocation7], %s3761_s21, %s3761_s21, %s3762_s22  }
  0x15   :  { %s3663_s27 = scalar_lea.hbm %s4466_s2, 2048 }
  0x16   :  { %p3664_p8 = scmp.ne.s32.totalorder %s4466_s2, %s3663_s27  ;;  %p3667_p9 = scmp.lt.u32.totalorder %s3663_s27, %s4466_s2 }
  0x18   :  { %p3669_p10 = pnand %p3667_p9, %p3664_p8 }
  0x1a   :  { %3672 = shalt.err (!%p3669_p10)
}
  0x1b   :  { %s3673_s13 = scalar_lea.vmem %s3820_s12, 2048  ;;  %p3678_p12 = scmp.lt.s32.totalorder %s3820_s12, %s3820_s12 }
  0x1c   :  { %p3674_p11 = scmp.ne.s32.totalorder %s3820_s12, %s3673_s13  ;;  %p3679_p13 = scmp.lt.s32.totalorder %s3673_s13, %s3673_s13 }
  0x1e   :  { %p3680_p0 = por %p3679_p13, %p3678_p12 }
  0x20   :  { %p3681_p1 = pnand %p3680_p0, %p3674_p11 }
  0x22   :  { %3684 = shalt.err (!%p3681_p1)
}
  0x23   :  { %33 = dma.hbm_to_vmem [thread:$0]  %s4466_s2, 2048, %s3820_s12, [#allocation4], %s3761_s21, %s3761_s21, %s3762_s22  }
  0x24   :  { %s3763_s14 = smov [#allocation8]   ;;  %s3764_s16 = smov [#allocation9]  }
  0x25   :  { %s53_s15 = sshll.u32 %s3763_s14, 4  ;;  %s67_s17 = sshll.u32 %s3764_s16, 4  ;;  %s54_s15 = int_to_ptr.vmem [resolvable:$true] %s53_s15  ;;  %s3857_s17 = int_to_ptr.vmem [resolvable:$true] %s67_s17 }
  0x26   :  { %s3685_s20 = scalar_lea.hbm %s4469_s5, 2048 }
  0x27   :  { %p3686_p2 = scmp.ne.s32.totalorder %s4469_s5, %s3685_s20  ;;  %p3689_p3 = scmp.lt.u32.totalorder %s3685_s20, %s4469_s5 }
  0x29   :  { %p3691_p4 = pnand %p3689_p3, %p3686_p2 }
  0x2b   :  { %3694 = shalt.err (!%p3691_p4)
}
  0x2c   :  { %s3695_s2 = scalar_lea.vmem %s54_s15, 2048  ;;  %p3700_p6 = scmp.lt.s32.totalorder %s54_s15, %s54_s15 }
  0x2d   :  { %p3696_p5 = scmp.ne.s32.totalorder %s54_s15, %s3695_s2  ;;  %p3701_p7 = scmp.lt.s32.totalorder %s3695_s2, %s3695_s2 }
  0x2f   :  { %p3702_p8 = por %p3701_p7, %p3700_p6 }
  0x31   :  { %p3703_p9 = pnand %p3702_p8, %p3696_p5 }
  0x33   :  { %3706 = shalt.err (!%p3703_p9)
}
  0x34   :  { %59 = dma.hbm_to_vmem [thread:$0]  %s4469_s5, 2048, %s54_s15, [#allocation7], %s3761_s21, %s3761_s21, %s3762_s22  }
  0x35   :  { %s3707_s30 = scalar_lea.hbm %s4471_s7, 2048 }
  0x36   :  { %p3708_p10 = scmp.ne.s32.totalorder %s4471_s7, %s3707_s30  ;;  %p3711_p11 = scmp.lt.u32.totalorder %s3707_s30, %s4471_s7 }
  0x38   :  { %p3713_p12 = pnand %p3711_p11, %p3708_p10 }
  0x3a   :  { %3716 = shalt.err (!%p3713_p12)
}
  0x3b   :  { %s3717_s14 = scalar_lea.vmem %s3857_s17, 2048  ;;  %p3722_p0 = scmp.lt.s32.totalorder %s3857_s17, %s3857_s17 }
  0x3c   :  { %p3718_p13 = scmp.ne.s32.totalorder %s3857_s17, %s3717_s14  ;;  %p3723_p1 = scmp.lt.s32.totalorder %s3717_s14, %s3717_s14 }
  0x3e   :  { %p3724_p2 = por %p3723_p1, %p3722_p0 }
  0x40   :  { %p3725_p3 = pnand %p3724_p2, %p3718_p13 }
  0x42   :  { %3728 = shalt.err (!%p3725_p3)
}
  0x43   :  { %73 = dma.hbm_to_vmem [thread:$0]  %s4471_s7, 2048, %s3857_s17, [#allocation10], %s3761_s21, %s3761_s21, %s3762_s22  }
  0x44   :  { %3751 = dma.done.wait [#allocation4], 2048  }
  0x45   :  { %3752 = vsyncadd [#allocation4], 4294965248 }
  0x46   :  { %3753 = dma.done.wait [#allocation7], 4096  }
  0x47   :  { %3754 = vsyncadd [#allocation7], 4294963200 }
  0x48   :  { %3755 = dma.done.wait [#allocation10], 2048  }
  0x49   :  { %3756 = vsyncadd [#allocation10], 4294965248  ;;  %v3765_v0 = vmov 0.0|0.0   ;;  %vm3766_vm0 = vmmov 0   ;;  %v3767_v1 = vmov 0.0   ;;  %v3768_v2 = vmov 0  }
  0x4a   :  { %3092 = vmatprep.subr.bf16.mxu0 %v3765_v0  ;;  %2342 = vmatprep.mubr.msk.f32.mxu0 %vm3766_vm0, %v3767_v1  ;;  %v99_v3 = vld [vmem:[#allocation3] sm:$0xff]  ;;  %v100_v4 = vld [vmem:[#allocation3 + $0x8] sm:$0xff]  ;;  %v101_v5 = vld [vmem:[#allocation3 + $0x10] sm:$0xff]  ;;  %s3769_s15 = smov [#allocation11]  }
  0x4b   :  { %3639 = vset.pattern.permute.xlu0 %v3768_v2  ;;  %3116 = vmatprep.subr.bf16.mxu1 %v3765_v0  ;;  %v3900_v6 = vpack.c.bf16 %v100_v4, %v99_v3  ;;  %v102_v7 = vld [vmem:[#allocation3 + $0x18] sm:$0xff]  ;;  %v103_v9 = vld [vmem:[#allocation3 + $0x20] sm:$0xff]  ;;  %v104_v10 = vld [vmem:[#allocation3 + $0x28] sm:$0xff]  ;;  %s1912_s7 = sshll.u32 %s3769_s15, 4  ;;  %s1913_s7 = int_to_ptr.vmem [resolvable:$true] %s1912_s7 }
  0x4c   :  { %2377 = vmatprep.mubr.msk.f32.mxu1 %vm3766_vm0, %v3767_v1  ;;  %3640 = vset.pattern.permute.xlu1 %v3768_v2  ;;  %v3903_v8 = vpack.c.bf16 %v102_v7, %v101_v5  ;;  %v88_v11 = vld [vmem:[%s4464_s0] sm:$0xff]  ;;  %v3912_v12 = vpack.c.bf16 %v104_v10, %v103_v9  ;;  %v89_v13 = vld [vmem:[%s4464_s0 + $0x8] sm:$0xff]  ;;  %v107_v18 = vld [vmem:[#allocation3 + $0x40] sm:$0xff]  ;;  %s3729_s21 = scalar_lea.vmem %s1913_s7, 128  ;;  %p3734_p5 = scmp.lt.s32.totalorder %s1913_s7, %s1913_s7 }
  0x4d   :  { %3094 = vmatpush3.bf16.msra.mxu0 %v3900_v6  ;;  %3118 = vmatpush3.bf16.msra.mxu1 %v3900_v6  ;;  %v105_v14 = vld [vmem:[#allocation3 + $0x30] sm:$0xff]  ;;  %v106_v15 = vld [vmem:[#allocation3 + $0x38] sm:$0xff]  ;;  %v108_v19 = vld [vmem:[#allocation3 + $0x48] sm:$0xff]  ;;  %p3730_p4 = scmp.ne.s32.totalorder %s1913_s7, %s3729_s21  ;;  %p3735_p6 = scmp.lt.s32.totalorder %s3729_s21, %s3729_s21 }
  0x4e   :  { %3095 = vmatprep.subr.bf16.mxu0 %v3765_v0  ;;  %3119 = vmatprep.subr.bf16.mxu1 %v3765_v0  ;;  %v3921_v16 = vpack.c.bf16 %v106_v15, %v105_v14  ;;  %v92_v17 = vld [vmem:[%s4464_s0 + $0x20] sm:$0xff]  ;;  %v3930_v20 = vpack.c.bf16 %v108_v19, %v107_v18  ;;  %v94_v21 = vld [vmem:[%s4464_s0 + $0x30] sm:$0xff]  ;;  %v110_v23 = vld [vmem:[#allocation3 + $0x58] sm:$0xff] }
  0x4f   :  { %118 = vperm.xlu0 %3639, %v88_v11   ;;  %v109_v22 = vld [vmem:[#allocation3 + $0x50] sm:$0xff]  ;;  %v111_v26 = vld [vmem:[#allocation3 + $0x60] sm:$0xff]  ;;  %v112_v27 = vld [vmem:[#allocation3 + $0x68] sm:$0xff]  ;;  %p3736_p7 = por %p3735_p6, %p3734_p5 }
  0x50   :  { %v3939_v24 = vpack.c.bf16 %v110_v23, %v109_v22  ;;  %v96_v25 = vld [vmem:[%s4464_s0 + $0x40] sm:$0xff]  ;;  %v3948_v28 = vpack.c.bf16 %v112_v27, %v111_v26  ;;  %v114_v30 = vld [vmem:[#allocation3 + $0x78] sm:$0xff]  ;;  %v90_v41 = vld [vmem:[%s4464_s0 + $0x10] sm:$0xff] }
  0x51   :  { %3097 = vmatpush3.bf16.msra.mxu0 %v3903_v8  ;;  %3121 = vmatpush3.bf16.msra.mxu1 %v3903_v8  ;;  %v113_v29 = vld [vmem:[#allocation3 + $0x70] sm:$0xff]  ;;  %v91_v42 = vld [vmem:[%s4464_s0 + $0x18] sm:$0xff]  ;;  %v93_v43 = vld [vmem:[%s4464_s0 + $0x28] sm:$0xff]  ;;  %p3737_p8 = pnand %p3736_p7, %p3730_p4 }
  0x52   :  { %3098 = vmatprep.subr.bf16.mxu0 %v3765_v0  ;;  %3122 = vmatprep.subr.bf16.mxu1 %v3765_v0  ;;  %v3954_v31 = vpack.c.bf16 %v114_v30, %v113_v29  ;;  %v3985_v32 = vld [vmem:[%s4465_s1] ss:$0 sm:$0xff]  ;;  %v95_v44 = vld [vmem:[%s4464_s0 + $0x38] sm:$0xff]  ;;  %v97_v45 = vld [vmem:[%s4464_s0 + $0x48] sm:$0xff] }
  0x53   :  { %123 = vperm.xlu0 %3639, %v89_v13   ;;  %v3991_v35 = vld [vmem:[%s4467_s3] ss:$0 sm:$0xff]  ;;  %128 = vperm.xlu1 %3640, %v90_v41  }
  0x55   :  { %3100 = vmatpush3.bf16.msra.mxu0 %v3912_v12  ;;  %3124 = vmatpush3.bf16.msra.mxu1 %v3912_v12 }
  0x56   :  { %3101 = vmatprep.subr.bf16.mxu0 %v3765_v0  ;;  %3125 = vmatprep.subr.bf16.mxu1 %v3765_v0 }
  0x57   :  { %138 = vperm.xlu0 %3639, %v92_v17   ;;  %133 = vperm.xlu1 %3640, %v91_v42  }
  0x59   :  { %3103 = vmatpush3.bf16.msra.mxu0 %v3921_v16  ;;  %3127 = vmatpush3.bf16.msra.mxu1 %v3921_v16 }
  0x5a   :  { %3104 = vmatprep.subr.bf16.mxu0 %v3765_v0  ;;  %3128 = vmatprep.subr.bf16.mxu1 %v3765_v0 }
  0x5b   :  { %148 = vperm.xlu0 %3639, %v94_v21   ;;  %143 = vperm.xlu1 %3640, %v93_v43  }
  0x5d   :  { %3106 = vmatpush3.bf16.msra.mxu0 %v3930_v20  ;;  %3130 = vmatpush3.bf16.msra.mxu1 %v3930_v20 }
  0x5e   :  { %3107 = vmatprep.subr.bf16.mxu0 %v3765_v0  ;;  %3131 = vmatprep.subr.bf16.mxu1 %v3765_v0 }
  0x5f   :  { %158 = vperm.xlu0 %3639, %v96_v25   ;;  %153 = vperm.xlu1 %3640, %v95_v44   ;;  %v942_v44 = vld [vmem:[#allocation6 + $0x20] sm:$0xff] }
  0x61   :  { %3109 = vmatpush3.bf16.msra.mxu0 %v3939_v24  ;;  %3133 = vmatpush3.bf16.msra.mxu1 %v3939_v24 }
  0x62   :  { %3110 = vmatprep.subr.bf16.mxu0 %v3765_v0  ;;  %3134 = vmatprep.subr.bf16.mxu1 %v3765_v0 }
  0x63   :  { %163 = vperm.xlu1 %3640, %v97_v45  }
  0x65   :  { %3112 = vmatpush3.bf16.msra.mxu0 %v3948_v28  ;;  %3136 = vmatpush3.bf16.msra.mxu1 %v3948_v28 }
  0x66   :  { %3113 = vmatprep.subr.bf16.mxu0 %v3765_v0  ;;  %3137 = vmatprep.subr.bf16.mxu1 %v3765_v0 }
  0x69   :  { %3115 = vmatpush3.bf16.msra.mxu0 %v3954_v31  ;;  %3139 = vmatpush3.bf16.msra.mxu1 %v3954_v31 }
  0x6a   :  { %3140 = vmatprep.subr.bf16.mxu0 %v3765_v0  ;;  %3164 = vmatprep.subr.bf16.mxu1 %v3765_v0 }
  0x6c   :  { %2343 = vmatmul.mubr.f32.vlgmr.msra.gmra.mrb[0].mxu0 %v3767_v1 }
  0x6d   :  { %3142 = vmatpush3.bf16.msra.mxu0 %v3900_v6  ;;  %2412 = vmatprep.mubr.msk.f32.mxu0 %vm3766_vm0, %v3767_v1 }
  0x6e   :  { %3143 = vmatprep.subr.bf16.mxu0 %v3765_v0 }
  0x71   :  { %3145 = vmatpush3.bf16.msra.mxu0 %v3903_v8 }
  0x72   :  { %3146 = vmatprep.subr.bf16.mxu0 %v3765_v0 }
  0x75   :  { %3148 = vmatpush3.bf16.msra.mxu0 %v3912_v12 }
  0x76   :  { %3149 = vmatprep.subr.bf16.mxu0 %v3765_v0 }
  0x79   :  { %3151 = vmatpush3.bf16.msra.mxu0 %v3921_v16 }
  0x7a   :  { %3152 = vmatprep.subr.bf16.mxu0 %v3765_v0 }
  0x7d   :  { %3154 = vmatpush3.bf16.msra.mxu0 %v3930_v20 }
  0x7e   :  { %3155 = vmatprep.subr.bf16.mxu0 %v3765_v0 }
  0x81   :  { %3157 = vmatpush3.bf16.msra.mxu0 %v3939_v24 }
  0x82   :  { %3158 = vmatprep.subr.bf16.mxu0 %v3765_v0 }
  0x85   :  { %3160 = vmatpush3.bf16.msra.mxu0 %v3948_v28 }
  0x86   :  { %3161 = vmatprep.subr.bf16.mxu0 %v3765_v0 }
  0x89   :  { %3163 = vmatpush3.bf16.msra.mxu0 %v3954_v31 }
  0x8a   :  { %3188 = vmatprep.subr.bf16.mxu0 %v3765_v0 }
  0xce   :  { %v119_v33 = vpop.permute.xlu0 %118 }
  0xcf   :  { %v172_v34 = vmul.f32 %v3985_v32, %v119_v33 }
  0xd1   :  { %v188_v36 = vadd.f32 %v3991_v35, %v172_v34 }
  0xd2   :  { %v124_v46 = vpop.permute.xlu0 %123  ;;  %v129_v53 = vpop.permute.xlu1 %128 }
  0xd3   :  { %v173_v47 = vmul.f32 %v3985_v32, %v124_v46  ;;  %v174_v54 = vmul.f32 %v3985_v32, %v129_v53  ;;  %v944_v46 = vld [vmem:[#allocation6 + $0x30] sm:$0xff] }
  0xd5   :  { %v189_v48 = vadd.f32 %v3991_v35, %v173_v47  ;;  %v190_v55 = vadd.f32 %v3991_v35, %v174_v54  ;;  %v945_v47 = vld [vmem:[#allocation6 + $0x38] sm:$0xff]  ;;  %v948_v54 = vld [vmem:[#allocation6 + $0x50] sm:$0xff] }
  0xd6   :  { %v134_v60 = vpop.permute.xlu1 %133  ;;  %v139_v5 = vpop.permute.xlu0 %138 }
  0xd7   :  { %v175_v61 = vmul.f32 %v3985_v32, %v134_v60  ;;  %v176_v7 = vmul.f32 %v3985_v32, %v139_v5  ;;  %v952_v60 = vld [vmem:[#allocation6 + $0x70] sm:$0xff] }
  0xd9   :  { %v191_v62 = vadd.f32 %v3991_v35, %v175_v61  ;;  %v192_v9 = vadd.f32 %v3991_v35, %v176_v7  ;;  %v953_v61 = vld [vmem:[#allocation6 + $0x78] sm:$0xff]  ;;  %v960_v7 = vld [vmem:[#allocation8 + $0x30] sm:$0xff] }
  0xda   :  { %v144_v15 = vpop.permute.xlu1 %143  ;;  %v149_v25 = vpop.permute.xlu0 %148 }
  0xdb   :  { %v177_v17 = vmul.f32 %v3985_v32, %v144_v15  ;;  %v178_v26 = vmul.f32 %v3985_v32, %v149_v25  ;;  %v964_v15 = vld [vmem:[#allocation8 + $0x50] sm:$0xff]  ;;  %v969_v25 = vld [vmem:[#allocation8 + $0x78] sm:$0xff] }
  0xdd   :  { %v193_v18 = vadd.f32 %v3991_v35, %v177_v17  ;;  %v194_v27 = vadd.f32 %v3991_v35, %v178_v26  ;;  %v965_v17 = vld [vmem:[#allocation8 + $0x58] sm:$0xff] }
 0x13f   :  { %v264_v37 = vpop.f32.mrb[0].mxu0 }
 0x140   :  { %v3994_v38 = vadd.f32 %v264_v37, %v188_v36  ;;  %v2344_v39 = vpop.f32.mrb[1].mxu0  ;;  %v940_v37 = vld [vmem:[#allocation6 + $0x10] sm:$0xff] }
 0x141   :  { %v941_v39 = vld [vmem:[#allocation6 + $0x18] sm:$0xff] }
 0x142   :  { %v269_v40 = vmax.f32 %v3994_v38, 0.0  ;;  %v3336_v43 = vpack.c.bf16 %v941_v39, %v940_v37  ;;  %v951_v38 = vld [vmem:[#allocation6 + $0x68] sm:$0xff] }
 0x144   :  { %2378 = vmatmul.mubr.f32.vlgmr.msra.gmra.mrb[0].mxu1 %v269_v40 }
 0x145   :  { %3166 = vmatpush3.bf16.msra.mxu1 %v3900_v6  ;;  %2447 = vmatprep.mubr.msk.f32.mxu1 %vm3766_vm0, %v3767_v1 }
 0x146   :  { %3167 = vmatprep.subr.bf16.mxu1 %v3765_v0 }
 0x149   :  { %3169 = vmatpush3.bf16.msra.mxu1 %v3903_v8 }
 0x14a   :  { %3170 = vmatprep.subr.bf16.mxu1 %v3765_v0 }
 0x14d   :  { %3172 = vmatpush3.bf16.msra.mxu1 %v3912_v12 }
 0x14e   :  { %3173 = vmatprep.subr.bf16.mxu1 %v3765_v0 }
 0x151   :  { %3175 = vmatpush3.bf16.msra.mxu1 %v3921_v16 }
 0x152   :  { %3176 = vmatprep.subr.bf16.mxu1 %v3765_v0 }
 0x155   :  { %3178 = vmatpush3.bf16.msra.mxu1 %v3930_v20 }
 0x156   :  { %3179 = vmatprep.subr.bf16.mxu1 %v3765_v0 }
 0x159   :  { %3181 = vmatpush3.bf16.msra.mxu1 %v3939_v24 }
 0x15a   :  { %3182 = vmatprep.subr.bf16.mxu1 %v3765_v0 }
 0x15d   :  { %3184 = vmatpush3.bf16.msra.mxu1 %v3948_v28 }
 0x15e   :  { %3185 = vmatprep.subr.bf16.mxu1 %v3765_v0 }
 0x161   :  { %3187 = vmatpush3.bf16.msra.mxu1 %v3954_v31 }
 0x162   :  { %3212 = vmatprep.subr.bf16.mxu1 %v3765_v0 }
 0x217   :  { %v337_v49 = vpop.f32.mrb[0].mxu1 }
 0x218   :  { %v4034_v50 = vadd.f32 %v337_v49, %v189_v48  ;;  %v2379_v51 = vpop.f32.mrb[1].mxu1  ;;  %v3344_v48 = vpack.c.bf16 %v945_v47, %v944_v46  ;;  %v946_v49 = vld [vmem:[#allocation6 + $0x40] sm:$0xff]  ;;  %v4290_v47 = vld [vmem:[%s4470_s6] ss:$0 sm:$0xff] }
 0x219   :  { %v947_v51 = vld [vmem:[#allocation6 + $0x48] sm:$0xff] }
 0x21a   :  { %v342_v52 = vmax.f32 %v4034_v50, 0.0  ;;  %v3348_v53 = vpack.c.bf16 %v947_v51, %v946_v49 }
 0x21c   :  { %2413 = vmatmul.mubr.f32.vlgmr.msra.gmra.mrb[2].mxu0 %v342_v52 }
 0x21d   :  { %3190 = vmatpush3.bf16.msra.mxu0 %v3900_v6  ;;  %2482 = vmatprep.mubr.msk.f32.mxu0 %vm3766_vm0, %v3767_v1 }
 0x21e   :  { %3191 = vmatprep.subr.bf16.mxu0 %v3765_v0 }
 0x221   :  { %3193 = vmatpush3.bf16.msra.mxu0 %v3903_v8 }
 0x222   :  { %3194 = vmatprep.subr.bf16.mxu0 %v3765_v0 }
 0x225   :  { %3196 = vmatpush3.bf16.msra.mxu0 %v3912_v12 }
 0x226   :  { %3197 = vmatprep.subr.bf16.mxu0 %v3765_v0 }
 0x229   :  { %3199 = vmatpush3.bf16.msra.mxu0 %v3921_v16 }
 0x22a   :  { %3200 = vmatprep.subr.bf16.mxu0 %v3765_v0 }
 0x22d   :  { %3202 = vmatpush3.bf16.msra.mxu0 %v3930_v20 }
 0x22e   :  { %3203 = vmatprep.subr.bf16.mxu0 %v3765_v0 }
 0x231   :  { %3205 = vmatpush3.bf16.msra.mxu0 %v3939_v24 }
 0x232   :  { %3206 = vmatprep.subr.bf16.mxu0 %v3765_v0 }
 0x235   :  { %3208 = vmatpush3.bf16.msra.mxu0 %v3948_v28 }
 0x236   :  { %3209 = vmatprep.subr.bf16.mxu0 %v3765_v0 }
 0x239   :  { %3211 = vmatpush3.bf16.msra.mxu0 %v3954_v31 }
 0x23a   :  { %3236 = vmatprep.subr.bf16.mxu0 %v3765_v0 }
 0x2ef   :  { %v410_v56 = vpop.f32.mrb[2].mxu0 }
 0x2f0   :  { %v4059_v57 = vadd.f32 %v410_v56, %v190_v55  ;;  %v2414_v58 = vpop.f32.mrb[3].mxu0  ;;  %v949_v55 = vld [vmem:[#allocation6 + $0x58] sm:$0xff] }
 0x2f1   :  { %v3352_v56 = vpack.c.bf16 %v949_v55, %v948_v54  ;;  %v950_v58 = vld [vmem:[#allocation6 + $0x60] sm:$0xff] }
 0x2f2   :  { %v415_v59 = vmax.f32 %v4059_v57, 0.0  ;;  %v957_v57 = vld [vmem:[#allocation8 + $0x18] sm:$0xff] }
 0x2f4   :  { %2448 = vmatmul.mubr.f32.vlgmr.msra.gmra.mrb[2].mxu1 %v415_v59 }
 0x2f5   :  { %3214 = vmatpush3.bf16.msra.mxu1 %v3900_v6  ;;  %2517 = vmatprep.mubr.msk.f32.mxu1 %vm3766_vm0, %v3767_v1 }
 0x2f6   :  { %3215 = vmatprep.subr.bf16.mxu1 %v3765_v0 }
 0x2f9   :  { %3217 = vmatpush3.bf16.msra.mxu1 %v3903_v8 }
 0x2fa   :  { %3218 = vmatprep.subr.bf16.mxu1 %v3765_v0 }
 0x2fd   :  { %3220 = vmatpush3.bf16.msra.mxu1 %v3912_v12 }
 0x2fe   :  { %3221 = vmatprep.subr.bf16.mxu1 %v3765_v0 }
 0x301   :  { %3223 = vmatpush3.bf16.msra.mxu1 %v3921_v16 }
 0x302   :  { %3224 = vmatprep.subr.bf16.mxu1 %v3765_v0 }
 0x305   :  { %3226 = vmatpush3.bf16.msra.mxu1 %v3930_v20 }
 0x306   :  { %3227 = vmatprep.subr.bf16.mxu1 %v3765_v0 }
 0x309   :  { %3229 = vmatpush3.bf16.msra.mxu1 %v3939_v24 }
 0x30a   :  { %3230 = vmatprep.subr.bf16.mxu1 %v3765_v0 }
 0x30d   :  { %3232 = vmatpush3.bf16.msra.mxu1 %v3948_v28 }
 0x30e   :  { %3233 = vmatprep.subr.bf16.mxu1 %v3765_v0 }
 0x311   :  { %3235 = vmatpush3.bf16.msra.mxu1 %v3954_v31 }
 0x312   :  { %3260 = vmatprep.subr.bf16.mxu1 %v3765_v0 }
 0x3c7   :  { %v483_v63 = vpop.f32.mrb[2].mxu1 }
 0x3c8   :  { %v4084_v2 = vadd.f32 %v483_v63, %v191_v62  ;;  %v2449_v3 = vpop.f32.mrb[3].mxu1  ;;  %v3360_v62 = vpack.c.bf16 %v953_v61, %v952_v60  ;;  %v954_v63 = vld [vmem:[#allocation8] sm:$0xff] }
 0x3c9   :  { %v955_v3 = vld [vmem:[#allocation8 + $0x8] sm:$0xff] }
 0x3ca   :  { %v488_v4 = vmax.f32 %v4084_v2, 0.0  ;;  %v4198_v50 = vpack.c.bf16 %v955_v3, %v954_v63  ;;  %v958_v2 = vld [vmem:[#allocation8 + $0x20] sm:$0xff] }
 0x3cc   :  { %2483 = vmatmul.mubr.f32.vlgmr.msra.gmra.mrb[4].mxu0 %v488_v4 }
 0x3cd   :  { %3238 = vmatpush3.bf16.msra.mxu0 %v3900_v6  ;;  %2552 = vmatprep.mubr.msk.f32.mxu0 %vm3766_vm0, %v3767_v1 }
 0x3ce   :  { %3239 = vmatprep.subr.bf16.mxu0 %v3765_v0 }
 0x3d1   :  { %3241 = vmatpush3.bf16.msra.mxu0 %v3903_v8 }
 0x3d2   :  { %3242 = vmatprep.subr.bf16.mxu0 %v3765_v0 }
 0x3d5   :  { %3244 = vmatpush3.bf16.msra.mxu0 %v3912_v12 }
 0x3d6   :  { %3245 = vmatprep.subr.bf16.mxu0 %v3765_v0 }
 0x3d9   :  { %3247 = vmatpush3.bf16.msra.mxu0 %v3921_v16 }
 0x3da   :  { %3248 = vmatprep.subr.bf16.mxu0 %v3765_v0 }
 0x3dd   :  { %3250 = vmatpush3.bf16.msra.mxu0 %v3930_v20 }
 0x3de   :  { %3251 = vmatprep.subr.bf16.mxu0 %v3765_v0 }
 0x3e1   :  { %3253 = vmatpush3.bf16.msra.mxu0 %v3939_v24 }
 0x3e2   :  { %3254 = vmatprep.subr.bf16.mxu0 %v3765_v0 }
 0x3e5   :  { %3256 = vmatpush3.bf16.msra.mxu0 %v3948_v28 }
 0x3e6   :  { %3257 = vmatprep.subr.bf16.mxu0 %v3765_v0 }
 0x3e9   :  { %3259 = vmatpush3.bf16.msra.mxu0 %v3954_v31 }
 0x3ea   :  { %3284 = vmatprep.subr.bf16.mxu0 %v3765_v0 }
 0x49f   :  { %v556_v10 = vpop.f32.mrb[4].mxu0 }
 0x4a0   :  { %v4109_v11 = vadd.f32 %v556_v10, %v192_v9  ;;  %v2484_v13 = vpop.f32.mrb[5].mxu0  ;;  %v961_v9 = vld [vmem:[#allocation8 + $0x38] sm:$0xff] }
 0x4a1   :  { %v4210_v10 = vpack.c.bf16 %v961_v9, %v960_v7  ;;  %v963_v13 = vld [vmem:[#allocation8 + $0x48] sm:$0xff] }
 0x4a2   :  { %v561_v14 = vmax.f32 %v4109_v11, 0.0  ;;  %v962_v11 = vld [vmem:[#allocation8 + $0x40] sm:$0xff] }
 0x4a4   :  { %2518 = vmatmul.mubr.f32.vlgmr.msra.gmra.mrb[4].mxu1 %v561_v14 }
 0x4a5   :  { %3262 = vmatpush3.bf16.msra.mxu1 %v3900_v6  ;;  %2587 = vmatprep.mubr.msk.f32.mxu1 %vm3766_vm0, %v3767_v1 }
 0x4a6   :  { %3263 = vmatprep.subr.bf16.mxu1 %v3765_v0 }
 0x4a9   :  { %3265 = vmatpush3.bf16.msra.mxu1 %v3903_v8 }
 0x4aa   :  { %3266 = vmatprep.subr.bf16.mxu1 %v3765_v0 }
 0x4ad   :  { %3268 = vmatpush3.bf16.msra.mxu1 %v3912_v12 }
 0x4ae   :  { %3269 = vmatprep.subr.bf16.mxu1 %v3765_v0 }
 0x4b1   :  { %3271 = vmatpush3.bf16.msra.mxu1 %v3921_v16 }
 0x4b2   :  { %3272 = vmatprep.subr.bf16.mxu1 %v3765_v0 }
 0x4b5   :  { %3274 = vmatpush3.bf16.msra.mxu1 %v3930_v20 }
 0x4b6   :  { %3275 = vmatprep.subr.bf16.mxu1 %v3765_v0 }
 0x4b9   :  { %3277 = vmatpush3.bf16.msra.mxu1 %v3939_v24 }
 0x4ba   :  { %3278 = vmatprep.subr.bf16.mxu1 %v3765_v0 }
 0x4bd   :  { %3280 = vmatpush3.bf16.msra.mxu1 %v3948_v28 }
 0x4be   :  { %3281 = vmatprep.subr.bf16.mxu1 %v3765_v0 }
 0x4c1   :  { %3283 = vmatpush3.bf16.msra.mxu1 %v3954_v31 }
 0x4c2   :  { %3308 = vmatprep.subr.bf16.mxu1 %v3765_v0 }
 0x577   :  { %v629_v19 = vpop.f32.mrb[4].mxu1 }
 0x578   :  { %v4134_v21 = vadd.f32 %v629_v19, %v193_v18  ;;  %v2519_v22 = vpop.f32.mrb[5].mxu1  ;;  %v4218_v18 = vpack.c.bf16 %v965_v17, %v964_v15  ;;  %v966_v19 = vld [vmem:[#allocation8 + $0x60] sm:$0xff] }
 0x57a   :  { %v634_v23 = vmax.f32 %v4134_v21, 0.0  ;;  %v967_v21 = vld [vmem:[#allocation8 + $0x68] sm:$0xff] }
 0x57b   :  { %v4222_v22 = vpack.c.bf16 %v967_v21, %v966_v19 }
 0x57c   :  { %2553 = vmatmul.mubr.f32.vlgmr.msra.gmra.mrb[6].mxu0 %v634_v23 }
 0x57d   :  { %3286 = vmatpush3.bf16.msra.mxu0 %v3900_v6  ;;  %2622 = vmatprep.mubr.msk.f32.mxu0 %vm3766_vm0, %v3767_v1 }
 0x57e   :  { %3287 = vmatprep.subr.bf16.mxu0 %v3765_v0 }
 0x581   :  { %3289 = vmatpush3.bf16.msra.mxu0 %v3903_v8 }
 0x582   :  { %3290 = vmatprep.subr.bf16.mxu0 %v3765_v0 }
 0x585   :  { %3292 = vmatpush3.bf16.msra.mxu0 %v3912_v12 }
 0x586   :  { %3293 = vmatprep.subr.bf16.mxu0 %v3765_v0 }
 0x589   :  { %3295 = vmatpush3.bf16.msra.mxu0 %v3921_v16 }
 0x58a   :  { %3296 = vmatprep.subr.bf16.mxu0 %v3765_v0 }
 0x58d   :  { %3298 = vmatpush3.bf16.msra.mxu0 %v3930_v20 }
 0x58e   :  { %3299 = vmatprep.subr.bf16.mxu0 %v3765_v0 }
 0x591   :  { %3301 = vmatpush3.bf16.msra.mxu0 %v3939_v24 }
 0x592   :  { %3302 = vmatprep.subr.bf16.mxu0 %v3765_v0 }
 0x595   :  { %3304 = vmatpush3.bf16.msra.mxu0 %v3948_v28 }
 0x596   :  { %3305 = vmatprep.subr.bf16.mxu0 %v3765_v0 }
 0x599   :  { %3307 = vmatpush3.bf16.msra.mxu0 %v3954_v31 }
 0x64f   :  { %v702_v29 = vpop.f32.mrb[6].mxu0 }
 0x650   :  { %v4158_v30 = vadd.f32 %v702_v29, %v194_v27  ;;  %v2554_v33 = vpop.f32.mrb[7].mxu0  ;;  %v159_v27 = vpop.permute.xlu0 %158 }
 0x651   :  { %v180_v29 = vmul.f32 %v3985_v32, %v159_v27 }
 0x652   :  { %v707_v34 = vmax.f32 %v4158_v30, 0.0 }
 0x653   :  { %v196_v30 = vadd.f32 %v3991_v35, %v180_v29 }
 0x654   :  { %2588 = vmatmul.mubr.f32.vlgmr.msra.gmra.mrb[6].mxu1 %v707_v34 }
 0x655   :  { %3310 = vmatpush3.bf16.msra.mxu1 %v3900_v6  ;;  %2657 = vmatprep.mubr.msk.f32.mxu1 %vm3766_vm0, %v3767_v1  ;;  %v938_v6 = vld [vmem:[#allocation6] sm:$0xff] }
 0x656   :  { %3311 = vmatprep.subr.bf16.mxu1 %v3765_v0 }
 0x659   :  { %3313 = vmatpush3.bf16.msra.mxu1 %v3903_v8  ;;  %v939_v8 = vld [vmem:[#allocation6 + $0x8] sm:$0xff] }
 0x65a   :  { %3314 = vmatprep.subr.bf16.mxu1 %v3765_v0 }
 0x65d   :  { %3316 = vmatpush3.bf16.msra.mxu1 %v3912_v12  ;;  %v3332_v12 = vpack.c.bf16 %v939_v8, %v938_v6 }
 0x65e   :  { %3317 = vmatprep.subr.bf16.mxu1 %v3765_v0 }
 0x65f   :  { %3333 = vmatprep.subr.bf16.mxu0 %v3332_v12 }
 0x661   :  { %3319 = vmatpush3.bf16.msra.mxu1 %v3921_v16  ;;  %v154_v16 = vpop.permute.xlu1 %153 }
 0x662   :  { %3320 = vmatprep.subr.bf16.mxu1 %v3765_v0 }
 0x665   :  { %3322 = vmatpush3.bf16.msra.mxu1 %v3930_v20  ;;  %v179_v20 = vmul.f32 %v3985_v32, %v154_v16 }
 0x666   :  { %3323 = vmatprep.subr.bf16.mxu1 %v3765_v0 }
 0x667   :  { %v195_v36 = vadd.f32 %v3991_v35, %v179_v20 }
 0x669   :  { %3325 = vmatpush3.bf16.msra.mxu1 %v3939_v24 }
 0x66a   :  { %3326 = vmatprep.subr.bf16.mxu1 %v3765_v0 }
 0x66d   :  { %3328 = vmatpush3.bf16.msra.mxu1 %v3948_v28 }
 0x66e   :  { %3329 = vmatprep.subr.bf16.mxu1 %v3765_v0 }
 0x671   :  { %3331 = vmatpush3.bf16.msra.mxu1 %v3954_v31  ;;  %v943_v31 = vld [vmem:[#allocation6 + $0x28] sm:$0xff] }
 0x672   :  { %3364 = vmatprep.subr.bf16.mxu1 %v3765_v0  ;;  %v3340_v45 = vpack.c.bf16 %v943_v31, %v942_v44 }
 0x727   :  { %v775_v24 = vpop.f32.mrb[6].mxu1 }
 0x728   :  { %v779_v41 = vadd.f32 %v775_v24, %v195_v36  ;;  %v2589_v28 = vpop.f32.mrb[7].mxu1 }
 0x729   :  { %v164_v28 = vpop.permute.xlu1 %163 }
 0x72a   :  { %v780_v42 = vmax.f32 %v779_v41, 0.0 }
 0x72c   :  { %2623 = vmatmul.mubr.f32.vlgmr.msra.gmra.mrb[8].mxu0 %v780_v42 }
 0x72d   :  { %3335 = vmatpush3.bf16.msra.mxu0 %v3332_v12  ;;  %2692 = vmatprep.mubr.f32.mxu0 %v269_v40  ;;  %v3356_v40 = vpack.c.bf16 %v951_v38, %v950_v58 }
 0x72e   :  { %3337 = vmatprep.subr.bf16.mxu0 %v3336_v43 }
 0x731   :  { %3339 = vmatpush3.bf16.msra.mxu0 %v3336_v43 }
 0x732   :  { %3341 = vmatprep.subr.bf16.mxu0 %v3340_v45 }
 0x735   :  { %3343 = vmatpush3.bf16.msra.mxu0 %v3340_v45 }
 0x736   :  { %3345 = vmatprep.subr.bf16.mxu0 %v3344_v48 }
 0x739   :  { %3347 = vmatpush3.bf16.msra.mxu0 %v3344_v48 }
 0x73a   :  { %3349 = vmatprep.subr.bf16.mxu0 %v3348_v53 }
 0x73d   :  { %3351 = vmatpush3.bf16.msra.mxu0 %v3348_v53 }
 0x73e   :  { %3353 = vmatprep.subr.bf16.mxu0 %v3352_v56 }
 0x741   :  { %3355 = vmatpush3.bf16.msra.mxu0 %v3352_v56 }
 0x742   :  { %3357 = vmatprep.subr.bf16.mxu0 %v3356_v40 }
 0x745   :  { %3359 = vmatpush3.bf16.msra.mxu0 %v3356_v40 }
 0x746   :  { %3361 = vmatprep.subr.bf16.mxu0 %v3360_v62 }
 0x749   :  { %3363 = vmatpush3.bf16.msra.mxu0 %v3360_v62 }
 0x74a   :  { %3388 = vmatprep.subr.bf16.mxu0 %v3765_v0 }
 0x74c   :  { %2693 = vmatmul.mubr.f32.vlgmr.msra.gmra.mrb[10].mxu0 %v342_v52  ;;  %v956_v52 = vld [vmem:[#allocation8 + $0x10] sm:$0xff] }
 0x74d   :  { %2695 = vmatprep.mubr.f32.mxu0 %v415_v59  ;;  %3390 = vmatpush3.bf16.msra.mxu0 %v4198_v50  ;;  %v4202_v59 = vpack.c.bf16 %v957_v57, %v956_v52 }
 0x74e   :  { %3391 = vmatprep.subr.bf16.mxu0 %v3765_v0 }
 0x750   :  { %2696 = vmatmul.mubr.f32.gmra.mrb[12].mxu0 %v488_v4  ;;  %v959_v4 = vld [vmem:[#allocation8 + $0x28] sm:$0xff] }
 0x751   :  { %2698 = vmatprep.mubr.f32.mxu0 %v561_v14  ;;  %3393 = vmatpush3.bf16.msra.mxu0 %v4202_v59  ;;  %v4206_v5 = vpack.c.bf16 %v959_v4, %v958_v2  ;;  %v4214_v14 = vpack.c.bf16 %v963_v13, %v962_v11 }
 0x752   :  { %3394 = vmatprep.subr.bf16.mxu0 %v3765_v0 }
 0x754   :  { %2699 = vmatmul.mubr.f32.gmra.mrb[14].mxu0 %v634_v23  ;;  %v968_v23 = vld [vmem:[#allocation8 + $0x70] sm:$0xff] }
 0x755   :  { %2701 = vmatprep.mubr.f32.mxu0 %v707_v34  ;;  %3396 = vmatpush3.bf16.msra.mxu0 %v4206_v5  ;;  %v4226_v26 = vpack.c.bf16 %v969_v25, %v968_v23 }
 0x756   :  { %3397 = vmatprep.subr.bf16.mxu0 %v3765_v0 }
 0x758   :  { %2702 = vmatmul.mubr.f32.gmra.mrb[16].mxu0 %v780_v42  ;;  %v181_v42 = vmul.f32 %v3985_v32, %v164_v28  ;;  %v1821_v28 = vld [vmem:[#allocation9 + $0x48] sm:$0xff] }
 0x759   :  { %3399 = vmatpush3.bf16.msra.mxu0 %v4210_v10 }
 0x75a   :  { %3400 = vmatprep.subr.bf16.mxu0 %v3765_v0  ;;  %v197_v43 = vadd.f32 %v3991_v35, %v181_v42 }
 0x75d   :  { %3402 = vmatpush3.bf16.msra.mxu0 %v4214_v14 }
 0x75e   :  { %3403 = vmatprep.subr.bf16.mxu0 %v3765_v0 }
 0x761   :  { %3405 = vmatpush3.bf16.msra.mxu0 %v4218_v18 }
 0x762   :  { %3406 = vmatprep.subr.bf16.mxu0 %v3765_v0 }
 0x765   :  { %3408 = vmatpush3.bf16.msra.mxu0 %v4222_v22 }
 0x766   :  { %3409 = vmatprep.subr.bf16.mxu0 %v3765_v0 }
 0x769   :  { %3411 = vmatpush3.bf16.msra.mxu0 %v4226_v26 }
 0x76a   :  { %3436 = vmatprep.subr.bf16.mxu0 %v3765_v0 }
 0x7ff   :  { %v848_v33 = vpop.f32.mrb[8].mxu0 }
 0x800   :  { %v852_v34 = vadd.f32 %v848_v33, %v196_v30  ;;  %v2624_v6 = vpop.f32.mrb[9].mxu0 }
 0x802   :  { %v853_v8 = vmax.f32 %v852_v34, 0.0 }
 0x804   :  { %2658 = vmatmul.mubr.f32.vlgmr.msra.gmra.mrb[8].mxu1 %v853_v8  ;;  %2704 = vmatprep.mubr.f32.mxu0 %v853_v8 }
 0x805   :  { %3366 = vmatpush3.bf16.msra.mxu1 %v4198_v50  ;;  %2739 = vmatprep.mubr.msk.f32.mxu1 %vm3766_vm0, %v3767_v1 }
 0x806   :  { %3367 = vmatprep.subr.bf16.mxu1 %v3765_v0 }
 0x809   :  { %3369 = vmatpush3.bf16.msra.mxu1 %v4202_v59 }
 0x80a   :  { %3370 = vmatprep.subr.bf16.mxu1 %v3765_v0 }
 0x80d   :  { %3372 = vmatpush3.bf16.msra.mxu1 %v4206_v5 }
 0x80e   :  { %3373 = vmatprep.subr.bf16.mxu1 %v3765_v0 }
 0x811   :  { %3375 = vmatpush3.bf16.msra.mxu1 %v4210_v10 }
 0x812   :  { %3376 = vmatprep.subr.bf16.mxu1 %v3765_v0 }
 0x815   :  { %3378 = vmatpush3.bf16.msra.mxu1 %v4214_v14 }
 0x816   :  { %3379 = vmatprep.subr.bf16.mxu1 %v3765_v0 }
 0x819   :  { %3381 = vmatpush3.bf16.msra.mxu1 %v4218_v18 }
 0x81a   :  { %3382 = vmatprep.subr.bf16.mxu1 %v3765_v0 }
 0x81d   :  { %3384 = vmatpush3.bf16.msra.mxu1 %v4222_v22 }
 0x81e   :  { %3385 = vmatprep.subr.bf16.mxu1 %v3765_v0 }
 0x81f   :  { %v4248_v12 = vpop.f32.mrb[10].mxu0 }
 0x820   :  { %v1043_v16 = vpop.f32.mrb[11].mxu0  ;;  %v1049_v55 = vadd.f32 %v4248_v12, %v4290_v47  ;;  %v1814_v12 = vld [vmem:[#allocation9 + $0x10] sm:$0xff] }
 0x821   :  { %3387 = vmatpush3.bf16.msra.mxu1 %v4226_v26  ;;  %v1044_v48 = vadd.f32 %v4290_v47, %v1043_v16 }
 0x822   :  { %3412 = vmatprep.subr.bf16.mxu1 %v3765_v0 }
 0x823   :  { %v4252_v20 = vpop.f32.mrb[12].mxu0 }
 0x824   :  { %v4254_v36 = vpop.f32.mrb[13].mxu0  ;;  %2740 = vmatmul.mubr.f32.vlgmr.msra.gmra.mrb[10].mxu1 %v3767_v1  ;;  %v1059_v52 = vadd.f32 %v4252_v20, %v4290_v47 }
 0x825   :  { %3414 = vmatpush3.bf16.msra.mxu1 %v4198_v50  ;;  %2809 = vmatprep.mubr.msk.f32.mxu1 %vm3766_vm0, %v3767_v1  ;;  %v1054_v60 = vadd.f32 %v4290_v47, %v4254_v36  ;;  %v1817_v36 = vld [vmem:[#allocation9 + $0x28] sm:$0xff] }
 0x826   :  { %3415 = vmatprep.subr.bf16.mxu1 %v3765_v0 }
 0x827   :  { %v4261_v24 = vpop.f32.mrb[14].mxu0 }
 0x828   :  { %v4263_v37 = vpop.f32.mrb[15].mxu0  ;;  %v1069_v19 = vadd.f32 %v4261_v24, %v4290_v47 }
 0x829   :  { %3417 = vmatpush3.bf16.msra.mxu1 %v4202_v59  ;;  %v1064_v9 = vadd.f32 %v4290_v47, %v4263_v37  ;;  %v1818_v37 = vld [vmem:[#allocation9 + $0x30] sm:$0xff] }
 0x82a   :  { %3418 = vmatprep.subr.bf16.mxu1 %v3765_v0 }
 0x82b   :  { %v4267_v39 = vpop.f32.mrb[16].mxu0 }
 0x82c   :  { %v4269_v41 = vpop.f32.mrb[17].mxu0 }
 0x82d   :  { %3420 = vmatpush3.bf16.msra.mxu1 %v4206_v5  ;;  %v1074_v29 = vadd.f32 %v4290_v47, %v4269_v41 }
 0x82e   :  { %3421 = vmatprep.subr.bf16.mxu1 %v3765_v0 }
 0x831   :  { %3423 = vmatpush3.bf16.msra.mxu1 %v4210_v10 }
 0x832   :  { %3424 = vmatprep.subr.bf16.mxu1 %v3765_v0 }
 0x835   :  { %3426 = vmatpush3.bf16.msra.mxu1 %v4214_v14 }
 0x836   :  { %3427 = vmatprep.subr.bf16.mxu1 %v3765_v0 }
 0x839   :  { %3429 = vmatpush3.bf16.msra.mxu1 %v4218_v18 }
 0x83a   :  { %3430 = vmatprep.subr.bf16.mxu1 %v3765_v0 }
 0x83d   :  { %3432 = vmatpush3.bf16.msra.mxu1 %v4222_v22 }
 0x83e   :  { %3433 = vmatprep.subr.bf16.mxu1 %v3765_v0 }
 0x841   :  { %3435 = vmatpush3.bf16.msra.mxu1 %v4226_v26 }
 0x842   :  { %3460 = vmatprep.subr.bf16.mxu1 %v3765_v0 }
 0x8d7   :  { %v921_v44 = vpop.f32.mrb[8].mxu1 }
 0x8d8   :  { %v925_v31 = vadd.f32 %v921_v44, %v197_v43  ;;  %v2659_v45 = vpop.f32.mrb[9].mxu1  ;;  %v1822_v43 = vld [vmem:[#allocation9 + $0x50] sm:$0xff]  ;;  %v1823_v44 = vld [vmem:[#allocation9 + $0x58] sm:$0xff] }
 0x8d9   :  { %v1824_v45 = vld [vmem:[#allocation9 + $0x60] sm:$0xff] }
 0x8da   :  { %v926_v46 = vmax.f32 %v925_v31, 0.0  ;;  %v3620_v31 = vpack.c.bf16 %v1823_v44, %v1822_v43 }
 0x8dc   :  { %2705 = vmatmul.mubr.f32.gmra.mrb[18].mxu0 %v926_v46  ;;  %v1825_v46 = vld [vmem:[#allocation9 + $0x68] sm:$0xff] }
 0x8dd   :  { %2774 = vmatprep.mubr.msk.f32.mxu0 %vm3766_vm0, %v3767_v1 }
 0x8f7   :  { %v1158_v49 = vpop.f32.mrb[10].mxu1 }
 0x8f8   :  { %v1162_v51 = vadd.f32 %v1158_v49, %v1044_v48  ;;  %v2741_v32 = vpop.f32.mrb[11].mxu1  ;;  %v3623_v48 = vpack.c.bf16 %v1825_v46, %v1824_v45 }
 0x8fa   :  { %v1163_v53 = vmax.f32 %v1162_v51, 0.0 }
 0x8fc   :  { %2775 = vmatmul.mubr.f32.vlgmr.msra.gmra.mrb[20].mxu0 %v1163_v53 }
 0x8fd   :  { %3438 = vmatpush3.bf16.msra.mxu0 %v4198_v50  ;;  %2844 = vmatprep.mubr.msk.f32.mxu0 %vm3766_vm0, %v3767_v1 }
 0x8fe   :  { %3439 = vmatprep.subr.bf16.mxu0 %v3765_v0 }
 0x901   :  { %3441 = vmatpush3.bf16.msra.mxu0 %v4202_v59 }
 0x902   :  { %3442 = vmatprep.subr.bf16.mxu0 %v3765_v0 }
 0x905   :  { %3444 = vmatpush3.bf16.msra.mxu0 %v4206_v5 }
 0x906   :  { %3445 = vmatprep.subr.bf16.mxu0 %v3765_v0 }
 0x909   :  { %3447 = vmatpush3.bf16.msra.mxu0 %v4210_v10 }
 0x90a   :  { %3448 = vmatprep.subr.bf16.mxu0 %v3765_v0 }
 0x90d   :  { %3450 = vmatpush3.bf16.msra.mxu0 %v4214_v14 }
 0x90e   :  { %3451 = vmatprep.subr.bf16.mxu0 %v3765_v0 }
 0x911   :  { %3453 = vmatpush3.bf16.msra.mxu0 %v4218_v18 }
 0x912   :  { %3454 = vmatprep.subr.bf16.mxu0 %v3765_v0 }
 0x915   :  { %3456 = vmatpush3.bf16.msra.mxu0 %v4222_v22 }
 0x916   :  { %3457 = vmatprep.subr.bf16.mxu0 %v3765_v0 }
 0x919   :  { %3459 = vmatpush3.bf16.msra.mxu0 %v4226_v26 }
 0x91a   :  { %3484 = vmatprep.subr.bf16.mxu0 %v3765_v0 }
 0x9af   :  { %v4311_v35 = vpop.f32.mrb[18].mxu0 }
 0x9b0   :  { %v4313_v54 = vpop.f32.mrb[19].mxu0 }
 0x9b1   :  { %v1084_v49 = vadd.f32 %v4290_v47, %v4313_v54 }
 0x9cf   :  { %v1230_v56 = vpop.f32.mrb[20].mxu0 }
 0x9d0   :  { %v1234_v58 = vadd.f32 %v1230_v56, %v1049_v55  ;;  %v2776_v38 = vpop.f32.mrb[21].mxu0  ;;  %v1826_v56 = vld [vmem:[#allocation9 + $0x70] sm:$0xff] }
 0x9d2   :  { %v1235_v40 = vmax.f32 %v1234_v58, 0.0  ;;  %v1827_v58 = vld [vmem:[#allocation9 + $0x78] sm:$0xff] }
 0x9d3   :  { %v3626_v38 = vpack.c.bf16 %v1827_v58, %v1826_v56 }
 0x9d4   :  { %2810 = vmatmul.mubr.f32.vlgmr.msra.gmra.mrb[12].mxu1 %v1235_v40  ;;  %v1089_v40 = vadd.f32 %v4311_v35, %v4290_v47 }
 0x9d5   :  { %3462 = vmatpush3.bf16.msra.mxu1 %v4198_v50  ;;  %2879 = vmatprep.mubr.msk.f32.mxu1 %vm3766_vm0, %v3767_v1 }
 0x9d6   :  { %3463 = vmatprep.subr.bf16.mxu1 %v3765_v0 }
 0x9d9   :  { %3465 = vmatpush3.bf16.msra.mxu1 %v4202_v59 }
 0x9da   :  { %3466 = vmatprep.subr.bf16.mxu1 %v3765_v0 }
 0x9dd   :  { %3468 = vmatpush3.bf16.msra.mxu1 %v4206_v5 }
 0x9de   :  { %3469 = vmatprep.subr.bf16.mxu1 %v3765_v0 }
 0x9e1   :  { %3471 = vmatpush3.bf16.msra.mxu1 %v4210_v10 }
 0x9e2   :  { %3472 = vmatprep.subr.bf16.mxu1 %v3765_v0 }
 0x9e5   :  { %3474 = vmatpush3.bf16.msra.mxu1 %v4214_v14 }
 0x9e6   :  { %3475 = vmatprep.subr.bf16.mxu1 %v3765_v0 }
 0x9e9   :  { %3477 = vmatpush3.bf16.msra.mxu1 %v4218_v18 }
 0x9ea   :  { %3478 = vmatprep.subr.bf16.mxu1 %v3765_v0 }
 0x9ed   :  { %3480 = vmatpush3.bf16.msra.mxu1 %v4222_v22 }
 0x9ee   :  { %3481 = vmatprep.subr.bf16.mxu1 %v3765_v0 }
 0x9f1   :  { %3483 = vmatpush3.bf16.msra.mxu1 %v4226_v26 }
 0x9f2   :  { %3508 = vmatprep.subr.bf16.mxu1 %v3765_v0 }
 0xaa7   :  { %v1302_v61 = vpop.f32.mrb[12].mxu1 }
 0xaa8   :  { %v1306_v62 = vadd.f32 %v1302_v61, %v1054_v60  ;;  %v2811_v63 = vpop.f32.mrb[13].mxu1 }
 0xaaa   :  { %v1307_v3 = vmax.f32 %v1306_v62, 0.0 }
 0xaac   :  { %2845 = vmatmul.mubr.f32.vlgmr.msra.gmra.mrb[22].mxu0 %v1307_v3 }
 0xaad   :  { %3486 = vmatpush3.bf16.msra.mxu0 %v4198_v50  ;;  %2914 = vmatprep.mubr.msk.f32.mxu0 %vm3766_vm0, %v3767_v1 }
 0xaae   :  { %3487 = vmatprep.subr.bf16.mxu0 %v3765_v0 }
 0xab1   :  { %3489 = vmatpush3.bf16.msra.mxu0 %v4202_v59 }
 0xab2   :  { %3490 = vmatprep.subr.bf16.mxu0 %v3765_v0 }
 0xab5   :  { %3492 = vmatpush3.bf16.msra.mxu0 %v4206_v5 }
 0xab6   :  { %3493 = vmatprep.subr.bf16.mxu0 %v3765_v0 }
 0xab9   :  { %3495 = vmatpush3.bf16.msra.mxu0 %v4210_v10 }
 0xaba   :  { %3496 = vmatprep.subr.bf16.mxu0 %v3765_v0 }
 0xabd   :  { %3498 = vmatpush3.bf16.msra.mxu0 %v4214_v14 }
 0xabe   :  { %3499 = vmatprep.subr.bf16.mxu0 %v3765_v0 }
 0xac1   :  { %3501 = vmatpush3.bf16.msra.mxu0 %v4218_v18 }
 0xac2   :  { %3502 = vmatprep.subr.bf16.mxu0 %v3765_v0 }
 0xac5   :  { %3504 = vmatpush3.bf16.msra.mxu0 %v4222_v22 }
 0xac6   :  { %3505 = vmatprep.subr.bf16.mxu0 %v3765_v0 }
 0xac9   :  { %3507 = vmatpush3.bf16.msra.mxu0 %v4226_v26 }
 0xaca   :  { %3532 = vmatprep.subr.bf16.mxu0 %v3765_v0 }
 0xb7f   :  { %v1374_v57 = vpop.f32.mrb[22].mxu0 }
 0xb80   :  { %v1378_v2 = vadd.f32 %v1374_v57, %v1059_v52  ;;  %v2846_v4 = vpop.f32.mrb[23].mxu0 }
 0xb82   :  { %v1379_v7 = vmax.f32 %v1378_v2, 0.0 }
 0xb84   :  { %2880 = vmatmul.mubr.f32.vlgmr.msra.gmra.mrb[14].mxu1 %v1379_v7 }
 0xb85   :  { %3510 = vmatpush3.bf16.msra.mxu1 %v4198_v50  ;;  %2949 = vmatprep.mubr.msk.f32.mxu1 %vm3766_vm0, %v3767_v1 }
 0xb86   :  { %3511 = vmatprep.subr.bf16.mxu1 %v3765_v0 }
 0xb89   :  { %3513 = vmatpush3.bf16.msra.mxu1 %v4202_v59 }
 0xb8a   :  { %3514 = vmatprep.subr.bf16.mxu1 %v3765_v0 }
 0xb8d   :  { %3516 = vmatpush3.bf16.msra.mxu1 %v4206_v5 }
 0xb8e   :  { %3517 = vmatprep.subr.bf16.mxu1 %v3765_v0 }
 0xb91   :  { %3519 = vmatpush3.bf16.msra.mxu1 %v4210_v10 }
 0xb92   :  { %3520 = vmatprep.subr.bf16.mxu1 %v3765_v0 }
 0xb95   :  { %3522 = vmatpush3.bf16.msra.mxu1 %v4214_v14 }
 0xb96   :  { %3523 = vmatprep.subr.bf16.mxu1 %v3765_v0 }
 0xb99   :  { %3525 = vmatpush3.bf16.msra.mxu1 %v4218_v18 }
 0xb9a   :  { %3526 = vmatprep.subr.bf16.mxu1 %v3765_v0 }
 0xb9d   :  { %3528 = vmatpush3.bf16.msra.mxu1 %v4222_v22 }
 0xb9e   :  { %3529 = vmatprep.subr.bf16.mxu1 %v3765_v0 }
 0xba1   :  { %3531 = vmatpush3.bf16.msra.mxu1 %v4226_v26 }
 0xba2   :  { %3556 = vmatprep.subr.bf16.mxu1 %v3765_v0 }
 0xc57   :  { %v1446_v11 = vpop.f32.mrb[14].mxu1 }
 0xc58   :  { %v1450_v13 = vadd.f32 %v1446_v11, %v1064_v9  ;;  %v2881_v15 = vpop.f32.mrb[15].mxu1 }
 0xc5a   :  { %v1451_v17 = vmax.f32 %v1450_v13, 0.0 }
 0xc5c   :  { %2915 = vmatmul.mubr.f32.vlgmr.msra.gmra.mrb[24].mxu0 %v1451_v17 }
 0xc5d   :  { %3534 = vmatpush3.bf16.msra.mxu0 %v4198_v50  ;;  %2984 = vmatprep.mubr.msk.f32.mxu0 %vm3766_vm0, %v3767_v1 }
 0xc5e   :  { %3535 = vmatprep.subr.bf16.mxu0 %v3765_v0 }
 0xc61   :  { %3537 = vmatpush3.bf16.msra.mxu0 %v4202_v59 }
 0xc62   :  { %3538 = vmatprep.subr.bf16.mxu0 %v3765_v0 }
 0xc65   :  { %3540 = vmatpush3.bf16.msra.mxu0 %v4206_v5 }
 0xc66   :  { %3541 = vmatprep.subr.bf16.mxu0 %v3765_v0 }
 0xc69   :  { %3543 = vmatpush3.bf16.msra.mxu0 %v4210_v10 }
 0xc6a   :  { %3544 = vmatprep.subr.bf16.mxu0 %v3765_v0 }
 0xc6d   :  { %3546 = vmatpush3.bf16.msra.mxu0 %v4214_v14 }
 0xc6e   :  { %3547 = vmatprep.subr.bf16.mxu0 %v3765_v0 }
 0xc71   :  { %3549 = vmatpush3.bf16.msra.mxu0 %v4218_v18 }
 0xc72   :  { %3550 = vmatprep.subr.bf16.mxu0 %v3765_v0 }
 0xc75   :  { %3552 = vmatpush3.bf16.msra.mxu0 %v4222_v22 }
 0xc76   :  { %3553 = vmatprep.subr.bf16.mxu0 %v3765_v0 }
 0xc79   :  { %3555 = vmatpush3.bf16.msra.mxu0 %v4226_v26 }
 0xc7a   :  { %3580 = vmatprep.subr.bf16.mxu0 %v3765_v0 }
 0xd2f   :  { %v1518_v21 = vpop.f32.mrb[24].mxu0 }
 0xd30   :  { %v1522_v23 = vadd.f32 %v1518_v21, %v1069_v19  ;;  %v2916_v25 = vpop.f32.mrb[25].mxu0 }
 0xd32   :  { %v1523_v27 = vmax.f32 %v1522_v23, 0.0 }
 0xd34   :  { %2950 = vmatmul.mubr.f32.vlgmr.msra.gmra.mrb[16].mxu1 %v1523_v27 }
 0xd35   :  { %3558 = vmatpush3.bf16.msra.mxu1 %v4198_v50  ;;  %3019 = vmatprep.mubr.msk.f32.mxu1 %vm3766_vm0, %v3767_v1 }
 0xd36   :  { %3559 = vmatprep.subr.bf16.mxu1 %v3765_v0 }
 0xd39   :  { %3561 = vmatpush3.bf16.msra.mxu1 %v4202_v59 }
 0xd3a   :  { %3562 = vmatprep.subr.bf16.mxu1 %v3765_v0 }
 0xd3d   :  { %3564 = vmatpush3.bf16.msra.mxu1 %v4206_v5 }
 0xd3e   :  { %3565 = vmatprep.subr.bf16.mxu1 %v3765_v0 }
 0xd41   :  { %3567 = vmatpush3.bf16.msra.mxu1 %v4210_v10 }
 0xd42   :  { %3568 = vmatprep.subr.bf16.mxu1 %v3765_v0 }
 0xd45   :  { %3570 = vmatpush3.bf16.msra.mxu1 %v4214_v14 }
 0xd46   :  { %3571 = vmatprep.subr.bf16.mxu1 %v3765_v0 }
 0xd49   :  { %3573 = vmatpush3.bf16.msra.mxu1 %v4218_v18 }
 0xd4a   :  { %3574 = vmatprep.subr.bf16.mxu1 %v3765_v0 }
 0xd4d   :  { %3576 = vmatpush3.bf16.msra.mxu1 %v4222_v22 }
 0xd4e   :  { %3577 = vmatprep.subr.bf16.mxu1 %v3765_v0 }
 0xd51   :  { %3579 = vmatpush3.bf16.msra.mxu1 %v4226_v26 }
 0xd52   :  { %3604 = vmatprep.subr.bf16.mxu1 %v3765_v0 }
 0xe07   :  { %v1590_v30 = vpop.f32.mrb[16].mxu1 }
 0xe08   :  { %v1594_v33 = vadd.f32 %v1590_v30, %v1074_v29  ;;  %v2951_v34 = vpop.f32.mrb[17].mxu1 }
 0xe0a   :  { %v1595_v6 = vmax.f32 %v1594_v33, 0.0 }
 0xe0c   :  { %2985 = vmatmul.mubr.f32.vlgmr.msra.gmra.mrb[26].mxu0 %v1595_v6 }
 0xe0d   :  { %3582 = vmatpush3.bf16.msra.mxu0 %v4198_v50  ;;  %3054 = vmatprep.mubr.msk.f32.mxu0 %vm3766_vm0, %v3767_v1  ;;  %v1079_v50 = vadd.f32 %v4267_v39, %v4290_v47  ;;  %v1819_v39 = vld [vmem:[#allocation9 + $0x38] sm:$0xff] }
 0xe0e   :  { %3583 = vmatprep.subr.bf16.mxu0 %v3765_v0  ;;  %v3614_v41 = vpack.c.bf16 %v1819_v39, %v1818_v37 }
 0xe11   :  { %3585 = vmatpush3.bf16.msra.mxu0 %v4202_v59 }
 0xe12   :  { %3586 = vmatprep.subr.bf16.mxu0 %v3765_v0 }
 0xe15   :  { %3588 = vmatpush3.bf16.msra.mxu0 %v4206_v5 }
 0xe16   :  { %3589 = vmatprep.subr.bf16.mxu0 %v3765_v0 }
 0xe19   :  { %3591 = vmatpush3.bf16.msra.mxu0 %v4210_v10 }
 0xe1a   :  { %3592 = vmatprep.subr.bf16.mxu0 %v3765_v0 }
 0xe1d   :  { %3594 = vmatpush3.bf16.msra.mxu0 %v4214_v14  ;;  %v1812_v14 = vld [vmem:[#allocation9] sm:$0xff] }
 0xe1e   :  { %3595 = vmatprep.subr.bf16.mxu0 %v3765_v0 }
 0xe21   :  { %3597 = vmatpush3.bf16.msra.mxu0 %v4218_v18  ;;  %v1813_v18 = vld [vmem:[#allocation9 + $0x8] sm:$0xff] }
 0xe22   :  { %3598 = vmatprep.subr.bf16.mxu0 %v3765_v0  ;;  %v3605_v16 = vpack.c.bf16 %v1813_v18, %v1812_v14 }
 0xe25   :  { %3600 = vmatpush3.bf16.msra.mxu0 %v4222_v22  ;;  %v1815_v22 = vld [vmem:[#allocation9 + $0x18] sm:$0xff] }
 0xe26   :  { %3601 = vmatprep.subr.bf16.mxu0 %v3765_v0  ;;  %v3608_v20 = vpack.c.bf16 %v1815_v22, %v1814_v12 }
 0xe29   :  { %3603 = vmatpush3.bf16.msra.mxu0 %v4226_v26  ;;  %v1816_v26 = vld [vmem:[#allocation9 + $0x20] sm:$0xff] }
 0xe2a   :  { %v3611_v24 = vpack.c.bf16 %v1817_v36, %v1816_v26 }
 0xedf   :  { %v1662_v59 = vpop.f32.mrb[26].mxu0 }
 0xee0   :  { %v1666_v5 = vadd.f32 %v1662_v59, %v1079_v50  ;;  %v2986_v10 = vpop.f32.mrb[27].mxu0 }
 0xee2   :  { %v1667_v8 = vmax.f32 %v1666_v5, 0.0 }
 0xee4   :  { %3020 = vmatmul.mubr.f32.vlgmr.msra.gmra.mrb[18].mxu1 %v1667_v8 }
 0xee5   :  { %3089 = vmatprep.mubr.msk.f32.mxu1 %vm3766_vm0, %v3767_v1  ;;  %3606 = vmatpush3.bf16.msra.mxu1 %v3605_v16  ;;  %v1820_v1 = vld [vmem:[#allocation9 + $0x40] sm:$0xff] }
 0xee6   :  { %3607 = vmatprep.subr.bf16.mxu1 %v3765_v0  ;;  %v3617_v42 = vpack.c.bf16 %v1821_v28, %v1820_v1 }
 0xee9   :  { %3609 = vmatpush3.bf16.msra.mxu1 %v3608_v20 }
 0xeea   :  { %3610 = vmatprep.subr.bf16.mxu1 %v3765_v0 }
 0xeed   :  { %3612 = vmatpush3.bf16.msra.mxu1 %v3611_v24 }
 0xeee   :  { %3613 = vmatprep.subr.bf16.mxu1 %v3765_v0 }
 0xef1   :  { %3615 = vmatpush3.bf16.msra.mxu1 %v3614_v41 }
 0xef2   :  { %3616 = vmatprep.subr.bf16.mxu1 %v3765_v0 }
 0xef5   :  { %3618 = vmatpush3.bf16.msra.mxu1 %v3617_v42 }
 0xef6   :  { %3619 = vmatprep.subr.bf16.mxu1 %v3765_v0 }
 0xef9   :  { %3621 = vmatpush3.bf16.msra.mxu1 %v3620_v31 }
 0xefa   :  { %3622 = vmatprep.subr.bf16.mxu1 %v3765_v0 }
 0xefd   :  { %3624 = vmatpush3.bf16.msra.mxu1 %v3623_v48 }
 0xefe   :  { %3625 = vmatprep.subr.bf16.mxu1 %v3765_v0  ;;  %v1926_v0 = vld [vmem:[%s4472_s8] ss:$0 sm:$0xff] }
 0xf01   :  { %3627 = vmatpush3.bf16.msra.mxu1 %v3626_v38 }
 0xfb7   :  { %v1734_v51 = vpop.f32.mrb[18].mxu1 }
 0xfb8   :  { %v1738_v32 = vadd.f32 %v1734_v51, %v1084_v49  ;;  %v3021_v53 = vpop.f32.mrb[19].mxu1 }
 0xfba   :  { %v1739_v55 = vmax.f32 %v1738_v32, 0.0 }
 0xfbc   :  { %3055 = vmatmul.mubr.f32.vlgmr.msra.gmra.mrb[28].mxu0 %v1739_v55 }
0x108f   :  { %v1806_v60 = vpop.f32.mrb[28].mxu0 }
0x1090   :  { %v1810_v61 = vadd.f32 %v1806_v60, %v1089_v40  ;;  %v3056_v62 = vpop.f32.mrb[29].mxu0 }
0x1092   :  { %v1811_v63 = vmax.f32 %v1810_v61, 0.0 }
0x1094   :  { %3090 = vmatmul.mubr.f32.vlgmr.msra.gmra.mrb[20].mxu1 %v1811_v63 }
0x1167   :  { %v1901_v54 = vpop.f32.mrb[20].mxu1 }
0x1168   :  { %v1902_v3 = vadd.f32 %v1926_v0, %v1901_v54  ;;  %v3091_v52 = vpop.f32.mrb[21].mxu1 }
0x116a   :  { %1905 = vst [vmem:[#allocation11] sm:$0xff] %v1902_v3 }
0x116b   :  { %3740 = shalt.err (!%p3737_p8)
}
0x116c   :  { %s3741_s17 = scalar_lea.hbm %s4473_s9, 128 }
0x116d   :  { %p3742_p9 = scmp.ne.s32.totalorder %s4473_s9, %s3741_s17  ;;  %p3745_p10 = scmp.lt.u32.totalorder %s3741_s17, %s4473_s9 }
0x116f   :  { %p3747_p11 = pnand %p3745_p10, %p3742_p9 }
0x1171   :  { %3750 = shalt.err (!%p3747_p11)
}
0x1172   :  { %1915 = dma.vmem_to_hbm [thread:$0]  %s1913_s7, 128, %s4473_s9, [#allocation5]  }
0x1173   :  { %3757 = dma.done.wait [#allocation5], 128  }
0x1174   :  { %3758 = vsyncadd [#allocation5], 4294967168 }
0x1175   :  { %1919 = vsyncpa [#allocation4], 1 }
0x1176   :  { %1920 = vsyncpa [#allocation7], 1 }
0x1177   :  { %1921 = vsyncpa [#allocation10], 1 }
0x1178   :  { %1922 = vsyncpa [#allocation5], 1 }

</bundles_post_ra>
